<compile_context>
chip_gen: v7x
topology: tpu7x:2x2x1
jax: 0.10.0
libtpu: 0.0.40
codegen_flags: <defaults>
</compile_context>

<pallas_src>
import jax
import jax.numpy as jnp
import numpy as np
from jax.experimental import pallas as pl
from jax.experimental.pallas import tpu as pltpu

LN_EPS = 1e-5  # torch.nn.LayerNorm default


def _conv_same_fused(x, w_cat, K, T, rows_mod):
    """'Same' conv (odd K) along rows of x, batches of T rows, as ONE matmul.

    x:        (M, Cin)  with M = B*T (rows of consecutive batches stacked)
    w_cat:    (K*Cin, Cout), block k == torch_weight[:, :, k].T
    rows_mod: (M, 1) int32, row index within its batch (t in [0, T)).
    """
    P = (K - 1) // 2
    M = x.shape[0]
    taps = []
    for k in range(K):
        s = k - P  # out[t] += x[t + s] @ W[k]
        if s == 0:
            taps.append(x)
            continue
        # pltpu.roll requires a non-negative shift; (-s) % M realizes shift by s.
        xt = pltpu.roll(x, shift=(-s) % M, axis=0)  # row t now holds x[t + s]
        lo = max(0, -s)            # zero 'same' padding at batch start
        hi = T - 1 - max(0, s)     # zero 'same' padding at batch end
        valid = (rows_mod >= lo) & (rows_mod <= hi)   # also kills cross-batch leak
        taps.append(jnp.where(valid, xt, 0.0))
    x_cat = taps[0] if K == 1 else jnp.concatenate(taps, axis=-1)  # (M, K*Cin)
    return jnp.dot(x_cat, w_cat, preferred_element_type=jnp.float32)


def positionwise_feed_forward(x, params, kernel_sizes):
    """x: (B, T, d_in) f32.  Returns (B, T, d_in) f32."""
    w1, b1, w2, b2, gamma, beta = params
    K1, K2 = kernel_sizes
    B, T, D = x.shape
    Hd = w1.shape[-1]
    BT = B * T

    # Lane-dense 2-D views / packed parameters (pure layout plumbing).
    x2d = x.reshape(BT, D)
    w1c = w1.reshape(K1 * D, Hd)     # (K1*d_in, d_hid)
    w2c = w2.reshape(K2 * Hd, D)     # (K2*d_hid, d_in)
    b1r = b1.reshape(1, Hd)
    pk = jnp.stack([b2, gamma, beta], axis=0)  # (3, d_in)

    def kernel(x_ref, w1_ref, b1_ref, w2_ref, pk_ref, out_ref):
        x_in = x_ref[...]                                              # (BT, D)
        # Row index within each batch, computed once and reused by both convs.
        rows_mod = jax.lax.broadcasted_iota(jnp.int32, (BT, 1), 0) % T

        # Conv1 (K1, same padding) -> bias -> ReLU
        h = _conv_same_fused(x_in, w1_ref[...], K1, T, rows_mod) + b1_ref[...]
        h = jnp.maximum(h, 0.0)

        # Conv2 (K2, same padding) -> bias
        h = _conv_same_fused(h, w2_ref[...], K2, T, rows_mod) + pk_ref[0:1, :]

        # Dropout = identity (inference); residual add; LayerNorm over features.
        h = h + x_in
        mu = jnp.mean(h, axis=-1, keepdims=True)
        var = jnp.mean((h - mu) ** 2, axis=-1, keepdims=True)
        out_ref[...] = ((h - mu) * jax.lax.rsqrt(var + LN_EPS)
                        * pk_ref[1:2, :] + pk_ref[2:3, :])

    out2d = pl.pallas_call(
        kernel,
        out_shape=jax.ShapeDtypeStruct((BT, D), jnp.float32),
        grid_spec=pltpu.PrefetchScalarGridSpec(
            num_scalar_prefetch=0,
            grid=(1,),
            in_specs=[
                pl.BlockSpec((BT, D), lambda i: (0, 0)),       # x (also residual)
                pl.BlockSpec((K1 * D, Hd), lambda i: (0, 0)),  # conv1 weight (stacked taps)
                pl.BlockSpec((1, Hd), lambda i: (0, 0)),       # conv1 bias
                pl.BlockSpec((K2 * Hd, D), lambda i: (0, 0)),  # conv2 weight (stacked taps)
                pl.BlockSpec((3, D), lambda i: (0, 0)),        # packed [b2, gamma, beta]
            ],
            out_specs=pl.BlockSpec((BT, D), lambda i: (0, 0)),
        ),
        compiler_params=pltpu.CompilerParams(
            dimension_semantics=("arbitrary",)),
    )(x2d, w1c, b1r, w2c, pk)

    return out2d.reshape(B, T, D)


def init_params(key, d_in, d_hid, K1, K2):
    ks = jax.random.split(key, 4)
    s1 = 1.0 / np.sqrt(K1 * d_in)
    s2 = 1.0 / np.sqrt(K2 * d_hid)
    # w[k] corresponds to torch conv weight[:, :, k].T  (Cin, Cout)
    w1 = jax.random.normal(ks[0], (K1, d_in, d_hid), jnp.float32) * s1
    b1 = jax.random.normal(ks[1], (d_hid,), jnp.float32) * s1
    w2 = jax.random.normal(ks[2], (K2, d_hid, d_in), jnp.float32) * s2
    b2 = jax.random.normal(ks[3], (d_in,), jnp.float32) * s2
    gamma = jnp.ones((d_in,), jnp.float32)
    beta = jnp.zeros((d_in,), jnp.float32)
    return (w1, b1, w2, b2, gamma, beta)


def reference_forward(x, params):
    """Pure-JAX reference replicating the PyTorch module semantics (eval mode)."""
    w1, b1, w2, b2, gamma, beta = params
    B, T, D = x.shape

    def conv_same(h, w, b):
        K = w.shape[0]
        P = (K - 1) // 2
        hp = jnp.pad(h, ((0, 0), (P, P), (0, 0)))
        out = sum(jnp.einsum('btc,cf->btf', hp[:, k:k + T], w[k]) for k in range(K))
        return out + b

    h = jnp.maximum(conv_same(x, w1, b1), 0.0)
    h = conv_same(h, w2, b2)
    h = h + x                      # dropout = identity in eval mode
    mu = jnp.mean(h, axis=-1, keepdims=True)
    var = jnp.mean((h - mu) ** 2, axis=-1, keepdims=True)
    return (h - mu) * jax.lax.rsqrt(var + LN_EPS) * gamma + beta


if __name__ == "__main__":
    # Scaled-down FastSpeech FFT-block sizes: d_in=128, d_hid=256, kernel=(9, 1).
    B, T, d_in, d_hid = 2, 16, 128, 256
    kernel_sizes = (9, 1)

    key = jax.random.PRNGKey(0)
    k_param, k_x = jax.random.split(key)
    params = init_params(k_param, d_in, d_hid, *kernel_sizes)
    x = jax.random.normal(k_x, (B, T, d_in), jnp.float32)

    out = positionwise_feed_forward(x, params, kernel_sizes)
    out = jax.block_until_ready(out)

    ref = reference_forward(x, params)
    np.testing.assert_allclose(np.asarray(out), np.asarray(ref), rtol=1e-3, atol=1e-3)
    assert out.shape == (B, T, d_in)

    print("KERNEL_OK")
</pallas_src>

<mosaic_0001>
module attributes {stable_mosaic.version = 11 : i64} {
  func.func @kernel(%arg0: i32, %arg1: memref<32x128xf32, #tpu.memory_space<vmem>>, %arg2: memref<1152x256xf32, #tpu.memory_space<vmem>>, %arg3: memref<1x256xf32, #tpu.memory_space<vmem>>, %arg4: memref<256x128xf32, #tpu.memory_space<vmem>>, %arg5: memref<3x128xf32, #tpu.memory_space<vmem>>, %arg6: memref<32x128xf32, #tpu.memory_space<vmem>>) attributes {dimension_semantics = [#tpu.dimension_semantics<arbitrary>], iteration_bounds = array<i64: 1>, scalar_prefetch = 0 : i64, scratch_operands = 0 : i64, tpu.core_type = #tpu.core_type<tc>, window_params = [{pipeline_mode = #tpu.pipeline_mode<synchronous>, transform_indices = @transform_0, window_bounds = array<i64: 32, 128>}, {pipeline_mode = #tpu.pipeline_mode<synchronous>, transform_indices = @transform_1, window_bounds = array<i64: 1152, 256>}, {pipeline_mode = #tpu.pipeline_mode<synchronous>, transform_indices = @transform_2, window_bounds = array<i64: 1, 256>}, {pipeline_mode = #tpu.pipeline_mode<synchronous>, transform_indices = @transform_3, window_bounds = array<i64: 256, 128>}, {pipeline_mode = #tpu.pipeline_mode<synchronous>, transform_indices = @transform_4, window_bounds = array<i64: 3, 128>}, {pipeline_mode = #tpu.pipeline_mode<synchronous>, transform_indices = @transform_5, window_bounds = array<i64: 32, 128>}]} {
    %c0 = arith.constant 0 : index
    %c0_0 = arith.constant 0 : index
    %0 = vector.load %arg1[%c0, %c0_0] : memref<32x128xf32, #tpu.memory_space<vmem>>, vector<32x128xf32>
    %1 = tpu.iota {dimensions = array<i32: 0>} : vector<32x1xi32>
    %c16_i32 = arith.constant 16 : i32
    %c0_i32 = arith.constant 0 : i32
    %2 = arith.cmpi eq, %c16_i32, %c0_i32 : i32
    %c1_i32 = arith.constant 1 : i32
    %3 = arith.select %2, %c1_i32, %c16_i32 : i32
    %4 = vector.broadcast %3 : i32 to vector<32x1xi32>
    %5 = arith.remsi %1, %4 : vector<32x1xi32>
    %c0_i32_1 = arith.constant 0 : i32
    %6 = vector.broadcast %c0_i32_1 : i32 to vector<32x1xi32>
    %7 = arith.cmpi ne, %5, %6 : vector<32x1xi32>
    %c0_i32_2 = arith.constant 0 : i32
    %8 = vector.broadcast %c0_i32_2 : i32 to vector<32x1xi32>
    %9 = arith.cmpi slt, %5, %8 : vector<32x1xi32>
    %c0_i32_3 = arith.constant 0 : i32
    %10 = arith.cmpi slt, %3, %c0_i32_3 : i32
    %11 = vector.broadcast %10 : i1 to vector<32x1xi1>
    %12 = vector.broadcast %11 : vector<32x1xi1> to vector<32x1xi1>
    %13 = arith.xori %9, %12 : vector<32x1xi1>
    %14 = arith.andi %13, %7 : vector<32x1xi1>
    %15 = vector.broadcast %3 : i32 to vector<32x1xi32>
    %16 = arith.addi %5, %15 : vector<32x1xi32>
    %17 = arith.select %14, %16, %5 : vector<32x1xi1>, vector<32x1xi32>
    %c0_4 = arith.constant 0 : index
    %c0_5 = arith.constant 0 : index
    %18 = vector.load %arg2[%c0_4, %c0_5] : memref<1152x256xf32, #tpu.memory_space<vmem>>, vector<1152x256xf32>
    %c4_i32 = arith.constant 4 : i32
    %19 = tpu.dynamic_rotate %0 by %c4_i32 dim 0 : vector<32x128xf32>, i32 -> vector<32x128xf32>
    %c4_i32_6 = arith.constant 4 : i32
    %20 = vector.broadcast %c4_i32_6 : i32 to vector<32x1xi32>
    %21 = arith.cmpi sge, %17, %20 : vector<32x1xi32>
    %c15_i32 = arith.constant 15 : i32
    %22 = vector.broadcast %c15_i32 : i32 to vector<32x1xi32>
    %23 = arith.cmpi sle, %17, %22 : vector<32x1xi32>
    %24 = arith.andi %21, %23 : vector<32x1xi1>
    %cst = arith.constant 0.000000e+00 : f32
    %25 = vector.shape_cast %24 : vector<32x1xi1> to vector<32x1xi1>
    %26 = vector.broadcast %25 : vector<32x1xi1> to vector<32x128xi1>
    %27 = vector.broadcast %cst : f32 to vector<32x128xf32>
    %28 = arith.select %26, %19, %27 : vector<32x128xi1>, vector<32x128xf32>
    %c3_i32 = arith.constant 3 : i32
    %29 = tpu.dynamic_rotate %0 by %c3_i32 dim 0 : vector<32x128xf32>, i32 -> vector<32x128xf32>
    %c3_i32_7 = arith.constant 3 : i32
    %30 = vector.broadcast %c3_i32_7 : i32 to vector<32x1xi32>
    %31 = arith.cmpi sge, %17, %30 : vector<32x1xi32>
    %c15_i32_8 = arith.constant 15 : i32
    %32 = vector.broadcast %c15_i32_8 : i32 to vector<32x1xi32>
    %33 = arith.cmpi sle, %17, %32 : vector<32x1xi32>
    %34 = arith.andi %31, %33 : vector<32x1xi1>
    %cst_9 = arith.constant 0.000000e+00 : f32
    %35 = vector.shape_cast %34 : vector<32x1xi1> to vector<32x1xi1>
    %36 = vector.broadcast %35 : vector<32x1xi1> to vector<32x128xi1>
    %37 = vector.broadcast %cst_9 : f32 to vector<32x128xf32>
    %38 = arith.select %36, %29, %37 : vector<32x128xi1>, vector<32x128xf32>
    %c2_i32 = arith.constant 2 : i32
    %39 = tpu.dynamic_rotate %0 by %c2_i32 dim 0 : vector<32x128xf32>, i32 -> vector<32x128xf32>
    %c2_i32_10 = arith.constant 2 : i32
    %40 = vector.broadcast %c2_i32_10 : i32 to vector<32x1xi32>
    %41 = arith.cmpi sge, %17, %40 : vector<32x1xi32>
    %c15_i32_11 = arith.constant 15 : i32
    %42 = vector.broadcast %c15_i32_11 : i32 to vector<32x1xi32>
    %43 = arith.cmpi sle, %17, %42 : vector<32x1xi32>
    %44 = arith.andi %41, %43 : vector<32x1xi1>
    %cst_12 = arith.constant 0.000000e+00 : f32
    %45 = vector.shape_cast %44 : vector<32x1xi1> to vector<32x1xi1>
    %46 = vector.broadcast %45 : vector<32x1xi1> to vector<32x128xi1>
    %47 = vector.broadcast %cst_12 : f32 to vector<32x128xf32>
    %48 = arith.select %46, %39, %47 : vector<32x128xi1>, vector<32x128xf32>
    %c1_i32_13 = arith.constant 1 : i32
    %49 = tpu.dynamic_rotate %0 by %c1_i32_13 dim 0 : vector<32x128xf32>, i32 -> vector<32x128xf32>
    %c1_i32_14 = arith.constant 1 : i32
    %50 = vector.broadcast %c1_i32_14 : i32 to vector<32x1xi32>
    %51 = arith.cmpi sge, %17, %50 : vector<32x1xi32>
    %c15_i32_15 = arith.constant 15 : i32
    %52 = vector.broadcast %c15_i32_15 : i32 to vector<32x1xi32>
    %53 = arith.cmpi sle, %17, %52 : vector<32x1xi32>
    %54 = arith.andi %51, %53 : vector<32x1xi1>
    %cst_16 = arith.constant 0.000000e+00 : f32
    %55 = vector.shape_cast %54 : vector<32x1xi1> to vector<32x1xi1>
    %56 = vector.broadcast %55 : vector<32x1xi1> to vector<32x128xi1>
    %57 = vector.broadcast %cst_16 : f32 to vector<32x128xf32>
    %58 = arith.select %56, %49, %57 : vector<32x128xi1>, vector<32x128xf32>
    %c31_i32 = arith.constant 31 : i32
    %59 = tpu.dynamic_rotate %0 by %c31_i32 dim 0 : vector<32x128xf32>, i32 -> vector<32x128xf32>
    %c0_i32_17 = arith.constant 0 : i32
    %60 = vector.broadcast %c0_i32_17 : i32 to vector<32x1xi32>
    %61 = arith.cmpi sge, %17, %60 : vector<32x1xi32>
    %c14_i32 = arith.constant 14 : i32
    %62 = vector.broadcast %c14_i32 : i32 to vector<32x1xi32>
    %63 = arith.cmpi sle, %17, %62 : vector<32x1xi32>
    %64 = arith.andi %61, %63 : vector<32x1xi1>
    %cst_18 = arith.constant 0.000000e+00 : f32
    %65 = vector.shape_cast %64 : vector<32x1xi1> to vector<32x1xi1>
    %66 = vector.broadcast %65 : vector<32x1xi1> to vector<32x128xi1>
    %67 = vector.broadcast %cst_18 : f32 to vector<32x128xf32>
    %68 = arith.select %66, %59, %67 : vector<32x128xi1>, vector<32x128xf32>
    %c30_i32 = arith.constant 30 : i32
    %69 = tpu.dynamic_rotate %0 by %c30_i32 dim 0 : vector<32x128xf32>, i32 -> vector<32x128xf32>
    %c0_i32_19 = arith.constant 0 : i32
    %70 = vector.broadcast %c0_i32_19 : i32 to vector<32x1xi32>
    %71 = arith.cmpi sge, %17, %70 : vector<32x1xi32>
    %c13_i32 = arith.constant 13 : i32
    %72 = vector.broadcast %c13_i32 : i32 to vector<32x1xi32>
    %73 = arith.cmpi sle, %17, %72 : vector<32x1xi32>
    %74 = arith.andi %71, %73 : vector<32x1xi1>
    %cst_20 = arith.constant 0.000000e+00 : f32
    %75 = vector.shape_cast %74 : vector<32x1xi1> to vector<32x1xi1>
    %76 = vector.broadcast %75 : vector<32x1xi1> to vector<32x128xi1>
    %77 = vector.broadcast %cst_20 : f32 to vector<32x128xf32>
    %78 = arith.select %76, %69, %77 : vector<32x128xi1>, vector<32x128xf32>
    %c29_i32 = arith.constant 29 : i32
    %79 = tpu.dynamic_rotate %0 by %c29_i32 dim 0 : vector<32x128xf32>, i32 -> vector<32x128xf32>
    %c0_i32_21 = arith.constant 0 : i32
    %80 = vector.broadcast %c0_i32_21 : i32 to vector<32x1xi32>
    %81 = arith.cmpi sge, %17, %80 : vector<32x1xi32>
    %c12_i32 = arith.constant 12 : i32
    %82 = vector.broadcast %c12_i32 : i32 to vector<32x1xi32>
    %83 = arith.cmpi sle, %17, %82 : vector<32x1xi32>
    %84 = arith.andi %81, %83 : vector<32x1xi1>
    %cst_22 = arith.constant 0.000000e+00 : f32
    %85 = vector.shape_cast %84 : vector<32x1xi1> to vector<32x1xi1>
    %86 = vector.broadcast %85 : vector<32x1xi1> to vector<32x128xi1>
    %87 = vector.broadcast %cst_22 : f32 to vector<32x128xf32>
    %88 = arith.select %86, %79, %87 : vector<32x128xi1>, vector<32x128xf32>
    %c28_i32 = arith.constant 28 : i32
    %89 = tpu.dynamic_rotate %0 by %c28_i32 dim 0 : vector<32x128xf32>, i32 -> vector<32x128xf32>
    %c0_i32_23 = arith.constant 0 : i32
    %90 = vector.broadcast %c0_i32_23 : i32 to vector<32x1xi32>
    %91 = arith.cmpi sge, %17, %90 : vector<32x1xi32>
    %c11_i32 = arith.constant 11 : i32
    %92 = vector.broadcast %c11_i32 : i32 to vector<32x1xi32>
    %93 = arith.cmpi sle, %17, %92 : vector<32x1xi32>
    %94 = arith.andi %91, %93 : vector<32x1xi1>
    %cst_24 = arith.constant 0.000000e+00 : f32
    %95 = vector.shape_cast %94 : vector<32x1xi1> to vector<32x1xi1>
    %96 = vector.broadcast %95 : vector<32x1xi1> to vector<32x128xi1>
    %97 = vector.broadcast %cst_24 : f32 to vector<32x128xf32>
    %98 = arith.select %96, %89, %97 : vector<32x128xi1>, vector<32x128xf32>
    %99 = tpu.concatenate %28, %38, %48, %58, %0, %68, %78, %88, %98 in 1 : vector<32x128xf32>, vector<32x128xf32>, vector<32x128xf32>, vector<32x128xf32>, vector<32x128xf32>, vector<32x128xf32>, vector<32x128xf32>, vector<32x128xf32>, vector<32x128xf32> -> vector<32x1152xf32>
    %cst_25 = arith.constant dense<0.000000e+00> : vector<32x256xf32>
    %100 = tpu.matmul %99, %18, %cst_25 {dimension_numbers = #tpu.dot_dimension_numbers<[1], [0], [0], [1], [0, 0, 1, 1], [], []>} : vector<32x1152xf32>, vector<1152x256xf32>, vector<32x256xf32> -> vector<32x256xf32>
    %c0_26 = arith.constant 0 : index
    %c0_27 = arith.constant 0 : index
    %101 = vector.load %arg3[%c0_26, %c0_27] : memref<1x256xf32, #tpu.memory_space<vmem>>, vector<1x256xf32>
    %102 = vector.broadcast %101 : vector<1x256xf32> to vector<32x256xf32>
    %103 = arith.addf %100, %102 : vector<32x256xf32>
    %cst_28 = arith.constant 0.000000e+00 : f32
    %104 = vector.broadcast %cst_28 : f32 to vector<32x256xf32>
    %105 = arith.maximumf %103, %104 : vector<32x256xf32>
    %c0_29 = arith.constant 0 : index
    %c0_30 = arith.constant 0 : index
    %106 = vector.load %arg4[%c0_29, %c0_30] : memref<256x128xf32, #tpu.memory_space<vmem>>, vector<256x128xf32>
    %cst_31 = arith.constant dense<0.000000e+00> : vector<32x128xf32>
    %107 = tpu.matmul %105, %106, %cst_31 {dimension_numbers = #tpu.dot_dimension_numbers<[1], [0], [0], [1], [0, 0, 1, 1], [], []>} : vector<32x256xf32>, vector<256x128xf32>, vector<32x128xf32> -> vector<32x128xf32>
    %c0_32 = arith.constant 0 : index
    %c0_33 = arith.constant 0 : index
    %108 = vector.load %arg5[%c0_32, %c0_33] : memref<3x128xf32, #tpu.memory_space<vmem>>, vector<1x128xf32>
    %109 = vector.broadcast %108 : vector<1x128xf32> to vector<32x128xf32>
    %110 = arith.addf %107, %109 : vector<32x128xf32>
    %111 = arith.addf %110, %0 : vector<32x128xf32>
    %cst_34 = arith.constant dense<0.000000e+00> : vector<32xf32>
    %112 = vector.multi_reduction <add>, %111, %cst_34 [1] : vector<32x128xf32> to vector<32xf32>
    %113 = vector.shape_cast %112 : vector<32xf32> to vector<32x1xf32>
    %cst_35 = arith.constant 1.280000e+02 : f32
    %114 = vector.broadcast %cst_35 : f32 to vector<32x1xf32>
    %115 = arith.divf %113, %114 : vector<32x1xf32>
    %116 = vector.broadcast %115 : vector<32x1xf32> to vector<32x128xf32>
    %117 = arith.subf %111, %116 : vector<32x128xf32>
    %118 = arith.mulf %117, %117 : vector<32x128xf32>
    %cst_36 = arith.constant dense<0.000000e+00> : vector<32xf32>
    %119 = vector.multi_reduction <add>, %118, %cst_36 [1] : vector<32x128xf32> to vector<32xf32>
    %120 = vector.shape_cast %119 : vector<32xf32> to vector<32x1xf32>
    %cst_37 = arith.constant 1.280000e+02 : f32
    %121 = vector.broadcast %cst_37 : f32 to vector<32x1xf32>
    %122 = arith.divf %120, %121 : vector<32x1xf32>
    %123 = vector.broadcast %115 : vector<32x1xf32> to vector<32x128xf32>
    %124 = arith.subf %111, %123 : vector<32x128xf32>
    %cst_38 = arith.constant 9.99999974E-6 : f32
    %125 = vector.broadcast %cst_38 : f32 to vector<32x1xf32>
    %126 = arith.addf %122, %125 : vector<32x1xf32>
    %127 = math.rsqrt %126 : vector<32x1xf32>
    %128 = vector.broadcast %127 : vector<32x1xf32> to vector<32x128xf32>
    %129 = arith.mulf %124, %128 : vector<32x128xf32>
    %c1 = arith.constant 1 : index
    %c0_39 = arith.constant 0 : index
    %130 = vector.load %arg5[%c1, %c0_39] : memref<3x128xf32, #tpu.memory_space<vmem>>, vector<1x128xf32>
    %131 = vector.broadcast %130 : vector<1x128xf32> to vector<32x128xf32>
    %132 = arith.mulf %129, %131 : vector<32x128xf32>
    %c2 = arith.constant 2 : index
    %c0_40 = arith.constant 0 : index
    %133 = vector.load %arg5[%c2, %c0_40] : memref<3x128xf32, #tpu.memory_space<vmem>>, vector<1x128xf32>
    %134 = vector.broadcast %133 : vector<1x128xf32> to vector<32x128xf32>
    %135 = arith.addf %132, %134 : vector<32x128xf32>
    %c0_41 = arith.constant 0 : index
    %c0_42 = arith.constant 0 : index
    %136 = vector.load %arg6[%c0_41, %c0_42] : memref<32x128xf32, #tpu.memory_space<vmem>>, vector<32x128xf32>
    tpu.vector_store %arg6[%c0_41, %c0_42], %135 {strides = array<i32>} : memref<32x128xf32, #tpu.memory_space<vmem>>, vector<32x128xf32>,
    return
  }
  func.func @transform_0(%arg0: i32) -> (i32, i32) {
    %c0_i32 = arith.constant 0 : i32
    %c0_i32_0 = arith.constant 0 : i32
    %c0_i32_1 = arith.constant 0 : i32
    return %c0_i32, %c0_i32_0 : i32, i32
  }
  func.func @transform_1(%arg0: i32) -> (i32, i32) {
    %c0_i32 = arith.constant 0 : i32
    %c0_i32_0 = arith.constant 0 : i32
    %c0_i32_1 = arith.constant 0 : i32
    return %c0_i32, %c0_i32_0 : i32, i32
  }
  func.func @transform_2(%arg0: i32) -> (i32, i32) {
    %c0_i32 = arith.constant 0 : i32
    %c0_i32_0 = arith.constant 0 : i32
    %c0_i32_1 = arith.constant 0 : i32
    return %c0_i32, %c0_i32_0 : i32, i32
  }
  func.func @transform_3(%arg0: i32) -> (i32, i32) {
    %c0_i32 = arith.constant 0 : i32
    %c0_i32_0 = arith.constant 0 : i32
    %c0_i32_1 = arith.constant 0 : i32
    return %c0_i32, %c0_i32_0 : i32, i32
  }
  func.func @transform_4(%arg0: i32) -> (i32, i32) {
    %c0_i32 = arith.constant 0 : i32
    %c0_i32_0 = arith.constant 0 : i32
    %c0_i32_1 = arith.constant 0 : i32
    return %c0_i32, %c0_i32_0 : i32, i32
  }
  func.func @transform_5(%arg0: i32) -> (i32, i32) {
    %c0_i32 = arith.constant 0 : i32
    %c0_i32_0 = arith.constant 0 : i32
    %c0_i32_1 = arith.constant 0 : i32
    return %c0_i32, %c0_i32_0 : i32, i32
  }
}

</mosaic_0001>

<bundles_post_ra>
// kernel: tpu_custom_call.1
= control target key start
LH: loop header
LB: loop body
LE: loop exit
PB: predicated region body
PF: predicated region fallthrough
CT: control target
= control target key end

     0   :  { %10 = vsyncpa [#allocation3], 0  ;;  %s2265_s0 = inlined_call_operand.hbm [shape: f32[32,128], index: 0, kind: input, shape index: {}]   ;;  %s2266_s1 = inlined_call_operand.hbm [shape: f32[1152,256], index: 1, kind: input, shape index: {}]   ;;  %s2267_s2 = inlined_call_operand.hbm [shape: f32[1,256], index: 2, kind: input, shape index: {}]   ;;  %s2268_s3 = inlined_call_operand.hbm [shape: f32[256,128], index: 3, kind: input, shape index: {}]   ;;  %s2269_s4 = inlined_call_operand.hbm [shape: f32[3,128], index: 4, kind: input, shape index: {}]   ;;  %s2270_s5 = inlined_call_operand.hbm [shape: f32[32,128], index: 5, kind: output, shape index: {}]  }
   0x1   :  { %11 = vsyncpa [#allocation6], 0 }
   0x2   :  { %12 = vsyncpa [#allocation9], 0 }
   0x3   :  { %13 = vsyncpa [#allocation4], 0  ;;  %s1923_s18 = smov [#allocation5]   ;;  %s1783_s22 = scalar_lea.hbm %s2266_s1, 36864 }
   0x4   :  { %s31_s19 = sshll.u32 %s1923_s18, 4  ;;  %p1784_p0 = scmp.ne.s32.totalorder %s2266_s1, %s1783_s22  ;;  %s32_s19 = int_to_ptr.vmem [resolvable:$true] %s31_s19 }
   0x5   :  { %p1787_p1 = scmp.lt.u32.totalorder %s1783_s22, %s2266_s1 }
   0x7   :  { %p1789_p2 = pnand %p1787_p1, %p1784_p0 }
   0x9   :  { %1792 = shalt.err (!%p1789_p2)
}
   0xa   :  { %s1793_s27 = scalar_lea.vmem %s32_s19, 36864  ;;  %p1798_p4 = scmp.lt.s32.totalorder %s32_s19, %s32_s19 }
   0xb   :  { %p1794_p3 = scmp.ne.s32.totalorder %s32_s19, %s1793_s27  ;;  %p1799_p5 = scmp.lt.s32.totalorder %s1793_s27, %s1793_s27 }
   0xd   :  { %p1800_p6 = por %p1799_p5, %p1798_p4 }
   0xf   :  { %p1801_p7 = pnand %p1800_p6, %p1794_p3 }
  0x11   :  { %1804 = shalt.err (!%p1801_p7)
}
  0x12   :  { %s1924_s28 = smov 256   ;;  %s1925_s29 = smov 16  }
  0x13   :  { %37 = dma.hbm_to_vmem [thread:$0]  %s2266_s1, 36864, %s32_s19, [#allocation6], %s1924_s28, %s1924_s28, %s1925_s29  }
  0x14   :  { %s1926_s7 = smov [#allocation8]   ;;  %s1927_s9 = smov [#allocation2]  }
  0x15   :  { %s53_s8 = sshll.u32 %s1926_s7, 4  ;;  %s19_s10 = sshll.u32 %s1927_s9, 4  ;;  %s54_s8 = int_to_ptr.vmem [resolvable:$true] %s53_s8  ;;  %s20_s10 = int_to_ptr.vmem [resolvable:$true] %s19_s10 }
  0x16   :  { %s1805_s13 = scalar_lea.hbm %s2268_s3, 4096 }
  0x17   :  { %p1806_p8 = scmp.ne.s32.totalorder %s2268_s3, %s1805_s13  ;;  %p1809_p9 = scmp.lt.u32.totalorder %s1805_s13, %s2268_s3 }
  0x19   :  { %p1811_p10 = pnand %p1809_p9, %p1806_p8 }
  0x1b   :  { %1814 = shalt.err (!%p1811_p10)
}
  0x1c   :  { %s1815_s1 = scalar_lea.vmem %s54_s8, 4096  ;;  %p1820_p12 = scmp.lt.s32.totalorder %s54_s8, %s54_s8 }
  0x1d   :  { %p1816_p11 = scmp.ne.s32.totalorder %s54_s8, %s1815_s1  ;;  %p1821_p13 = scmp.lt.s32.totalorder %s1815_s1, %s1815_s1 }
  0x1f   :  { %p1822_p0 = por %p1821_p13, %p1820_p12 }
  0x21   :  { %p1823_p1 = pnand %p1822_p0, %p1816_p11 }
  0x23   :  { %1826 = shalt.err (!%p1823_p1)
}
  0x24   :  { %s1928_s18 = smov 128   ;;  %s1929_s19 = smov 8  }
  0x25   :  { %59 = dma.hbm_to_vmem [thread:$0]  %s2268_s3, 4096, %s54_s8, [#allocation9], %s1928_s18, %s1928_s18, %s1929_s19  }
  0x26   :  { %s1827_s24 = scalar_lea.hbm %s2265_s0, 512 }
  0x27   :  { %p1828_p2 = scmp.ne.s32.totalorder %s2265_s0, %s1827_s24  ;;  %p1831_p3 = scmp.lt.u32.totalorder %s1827_s24, %s2265_s0 }
  0x29   :  { %p1833_p4 = pnand %p1831_p3, %p1828_p2 }
  0x2b   :  { %1836 = shalt.err (!%p1833_p4)
}
  0x2c   :  { %s1837_s29 = scalar_lea.vmem %s20_s10, 512  ;;  %p1842_p6 = scmp.lt.s32.totalorder %s20_s10, %s20_s10 }
  0x2d   :  { %p1838_p5 = scmp.ne.s32.totalorder %s20_s10, %s1837_s29  ;;  %p1843_p7 = scmp.lt.s32.totalorder %s1837_s29, %s1837_s29 }
  0x2f   :  { %p1844_p8 = por %p1843_p7, %p1842_p6 }
  0x31   :  { %p1845_p9 = pnand %p1844_p8, %p1838_p5 }
  0x33   :  { %1848 = shalt.err (!%p1845_p9)
}
  0x34   :  { %25 = dma.hbm_to_vmem [thread:$0]  %s2265_s0, 512, %s20_s10, [#allocation3], %s1928_s18, %s1928_s18, %s1929_s19  }
  0x35   :  { %s1930_s6 = smov [#allocation7]   ;;  %s1931_s8 = smov [#allocation10]  }
  0x36   :  { %s44_s7 = sshll.u32 %s1930_s6, 4  ;;  %s66_s9 = sshll.u32 %s1931_s8, 4  ;;  %s45_s7 = int_to_ptr.vmem [resolvable:$true] %s44_s7  ;;  %s67_s9 = int_to_ptr.vmem [resolvable:$true] %s66_s9 }
  0x37   :  { %s1849_s13 = scalar_lea.hbm %s2267_s2, 32 }
  0x38   :  { %p1850_p10 = scmp.ne.s32.totalorder %s2267_s2, %s1849_s13  ;;  %p1853_p11 = scmp.lt.u32.totalorder %s1849_s13, %s2267_s2 }
  0x3a   :  { %p1855_p12 = pnand %p1853_p11, %p1850_p10 }
  0x3c   :  { %1858 = shalt.err (!%p1855_p12)
}
  0x3d   :  { %s1859_s0 = scalar_lea.vmem %s45_s7, 32  ;;  %p1864_p0 = scmp.lt.s32.totalorder %s45_s7, %s45_s7 }
  0x3e   :  { %p1860_p13 = scmp.ne.s32.totalorder %s45_s7, %s1859_s0  ;;  %p1865_p1 = scmp.lt.s32.totalorder %s1859_s0, %s1859_s0 }
  0x40   :  { %p1866_p2 = por %p1865_p1, %p1864_p0 }
  0x42   :  { %p1867_p3 = pnand %p1866_p2, %p1860_p13 }
  0x44   :  { %1870 = shalt.err (!%p1867_p3)
}
  0x45   :  { %47 = dma.hbm_to_vmem [thread:$0]  %s2267_s2, 32, %s45_s7, [#allocation6]  }
  0x46   :  { %s1871_s22 = scalar_lea.hbm %s2269_s4, 64 }
  0x47   :  { %p1872_p4 = scmp.ne.s32.totalorder %s2269_s4, %s1871_s22  ;;  %p1875_p5 = scmp.lt.u32.totalorder %s1871_s22, %s2269_s4 }
  0x49   :  { %p1877_p6 = pnand %p1875_p5, %p1872_p4 }
  0x4b   :  { %1880 = shalt.err (!%p1877_p6)
}
  0x4c   :  { %s1881_s27 = scalar_lea.vmem %s67_s9, 64  ;;  %p1886_p8 = scmp.lt.s32.totalorder %s67_s9, %s67_s9 }
  0x4d   :  { %p1882_p7 = scmp.ne.s32.totalorder %s67_s9, %s1881_s27  ;;  %p1887_p9 = scmp.lt.s32.totalorder %s1881_s27, %s1881_s27 }
  0x4f   :  { %p1888_p10 = por %p1887_p9, %p1886_p8 }
  0x51   :  { %p1889_p11 = pnand %p1888_p10, %p1882_p7 }
  0x53   :  { %1892 = shalt.err (!%p1889_p11)
}
  0x54   :  { %69 = dma.hbm_to_vmem [thread:$0]  %s2269_s4, 64, %s67_s9, [#allocation9]  }
  0x55   :  { %1915 = dma.done.wait [#allocation3], 512  }
  0x56   :  { %1916 = vsyncadd [#allocation3], 4294966784 }
  0x57   :  { %1917 = dma.done.wait [#allocation6], 36896  }
  0x58   :  { %1918 = vsyncadd [#allocation6], 4294930400 }
  0x59   :  { %1919 = dma.done.wait [#allocation9], 4160  }
  0x5a   :  { %1920 = vsyncadd [#allocation9], 4294963136  ;;  %v143_v0 = vld [vmem:[#allocation5 + $0x8] sm:$0xff]  ;;  %v145_v1 = vld [vmem:[#allocation5 + $0x18] sm:$0xff]  ;;  %s1933_s4 = smov [#allocation11]  }
  0x5b   :  { %v271_v2 = vld [vmem:[#allocation5 + $0x408] sm:$0xff]  ;;  %v1401_v3 = vpack.c.bf16 %v145_v1, %v143_v0  ;;  %v273_v4 = vld [vmem:[#allocation5 + $0x418] sm:$0xff]  ;;  %v142_v5 = vld [vmem:[#allocation5] sm:$0xff]  ;;  %s1324_s29 = sshll.u32 %s1933_s4, 4  ;;  %s1325_s29 = int_to_ptr.vmem [resolvable:$true] %s1324_s29 }
  0x5c   :  { %v144_v6 = vld [vmem:[#allocation5 + $0x10] sm:$0xff]  ;;  %v1529_v7 = vpack.c.bf16 %v273_v4, %v271_v2  ;;  %v270_v9 = vld [vmem:[#allocation5 + $0x400] sm:$0xff]  ;;  %v147_v11 = vld [vmem:[#allocation5 + $0x28] sm:$0xff]  ;;  %s1893_s3 = scalar_lea.vmem %s1325_s29, 512  ;;  %p1898_p13 = scmp.lt.s32.totalorder %s1325_s29, %s1325_s29 }
  0x5d   :  { %v1403_v8 = vpack.c.bf16 %v144_v6, %v142_v5  ;;  %v272_v10 = vld [vmem:[#allocation5 + $0x410] sm:$0xff]  ;;  %1402 = vmatprep.subr.bf16.mxu1 %v1401_v3  ;;  %v149_v13 = vld [vmem:[#allocation5 + $0x38] sm:$0xff]  ;;  %v275_v14 = vld [vmem:[#allocation5 + $0x428] sm:$0xff]  ;;  %p1894_p12 = scmp.ne.s32.totalorder %s1325_s29, %s1893_s3  ;;  %p1899_p0 = scmp.lt.s32.totalorder %s1893_s3, %s1893_s3 }
  0x5e   :  { %v1531_v12 = vpack.c.bf16 %v272_v10, %v270_v9  ;;  %v277_v15 = vld [vmem:[#allocation5 + $0x438] sm:$0xff]  ;;  %1530 = vmatprep.subr.bf16.mxu0 %v1529_v7  ;;  %v1405_v16 = vpack.c.bf16 %v149_v13, %v147_v11  ;;  %v146_v18 = vld [vmem:[#allocation5 + $0x20] sm:$0xff]  ;;  %v148_v19 = vld [vmem:[#allocation5 + $0x30] sm:$0xff] }
  0x5f   :  { %1404 = vmatpush1.bf16.msra.mxu1 %v1403_v8  ;;  %v1533_v17 = vpack.c.bf16 %v277_v15, %v275_v14  ;;  %v274_v20 = vld [vmem:[#allocation5 + $0x420] sm:$0xff]  ;;  %v1407_v21 = vpack.c.bf16 %v148_v19, %v146_v18  ;;  %v276_v22 = vld [vmem:[#allocation5 + $0x430] sm:$0xff]  ;;  %v151_v23 = vld [vmem:[#allocation5 + $0x48] sm:$0xff]  ;;  %p1900_p1 = por %p1899_p0, %p1898_p13 }
  0x60   :  { %1532 = vmatpush1.bf16.msra.mxu0 %v1531_v12  ;;  %v153_v24 = vld [vmem:[#allocation5 + $0x58] sm:$0xff]  ;;  %1406 = vmatprep.subr.bf16.mxu1 %v1405_v16  ;;  %v1535_v25 = vpack.c.bf16 %v276_v22, %v274_v20  ;;  %v279_v27 = vld [vmem:[#allocation5 + $0x448] sm:$0xff]  ;;  %v150_v29 = vld [vmem:[#allocation5 + $0x40] sm:$0xff] }
  0x61   :  { %1534 = vmatprep.subr.bf16.mxu0 %v1533_v17  ;;  %v1409_v26 = vpack.c.bf16 %v153_v24, %v151_v23  ;;  %v281_v28 = vld [vmem:[#allocation5 + $0x458] sm:$0xff]  ;;  %v152_v31 = vld [vmem:[#allocation5 + $0x50] sm:$0xff]  ;;  %v278_v32 = vld [vmem:[#allocation5 + $0x440] sm:$0xff]  ;;  %p1901_p2 = pnand %p1900_p1, %p1894_p12 }
  0x62   :  { %v1537_v30 = vpack.c.bf16 %v281_v28, %v279_v27  ;;  %v280_v33 = vld [vmem:[#allocation5 + $0x450] sm:$0xff]  ;;  %v1411_v34 = vpack.c.bf16 %v152_v31, %v150_v29  ;;  %v155_v35 = vld [vmem:[#allocation5 + $0x68] sm:$0xff]  ;;  %v157_v36 = vld [vmem:[#allocation5 + $0x78] sm:$0xff] }
  0x63   :  { %1408 = vmatpush1.bf16.msra.mxu1 %v1407_v21  ;;  %v283_v37 = vld [vmem:[#allocation5 + $0x468] sm:$0xff]  ;;  %v1539_v38 = vpack.c.bf16 %v280_v33, %v278_v32  ;;  %v1413_v39 = vpack.c.bf16 %v157_v36, %v155_v35  ;;  %v285_v40 = vld [vmem:[#allocation5 + $0x478] sm:$0xff]  ;;  %v154_v41 = vld [vmem:[#allocation5 + $0x60] sm:$0xff] }
  0x64   :  { %1536 = vmatpush1.bf16.msra.mxu0 %v1535_v25  ;;  %1410 = vmatprep.subr.bf16.mxu1 %v1409_v26  ;;  %v156_v42 = vld [vmem:[#allocation5 + $0x70] sm:$0xff]  ;;  %v1541_v43 = vpack.c.bf16 %v285_v40, %v283_v37  ;;  %v282_v44 = vld [vmem:[#allocation5 + $0x460] sm:$0xff]  ;;  %v159_v46 = vld [vmem:[#allocation5 + $0x88] sm:$0xff] }
  0x65   :  { %1538 = vmatprep.subr.bf16.mxu0 %v1537_v30  ;;  %v284_v45 = vld [vmem:[#allocation5 + $0x470] sm:$0xff]  ;;  %v161_v47 = vld [vmem:[#allocation5 + $0x98] sm:$0xff]  ;;  %v287_v48 = vld [vmem:[#allocation5 + $0x488] sm:$0xff]  ;;  %v1415_v50 = vpack.c.bf16 %v156_v42, %v154_v41 }
  0x66   :  { %v289_v49 = vld [vmem:[#allocation5 + $0x498] sm:$0xff]  ;;  %v1543_v51 = vpack.c.bf16 %v284_v45, %v282_v44  ;;  %v1417_v52 = vpack.c.bf16 %v161_v47, %v159_v46  ;;  %v158_v53 = vld [vmem:[#allocation5 + $0x80] sm:$0xff]  ;;  %v160_v54 = vld [vmem:[#allocation5 + $0x90] sm:$0xff]  ;;  %v89_v47 = vlaneseq }
  0x67   :  { %1412 = vmatpush1.bf16.msra.mxu1 %v1411_v34  ;;  %v286_v55 = vld [vmem:[#allocation5 + $0x480] sm:$0xff]  ;;  %v1545_v56 = vpack.c.bf16 %v289_v49, %v287_v48  ;;  %v288_v57 = vld [vmem:[#allocation5 + $0x490] sm:$0xff]  ;;  %v163_v58 = vld [vmem:[#allocation5 + $0xa8] sm:$0xff]  ;;  %v1419_v62 = vpack.c.bf16 %v160_v54, %v158_v53 }
  0x68   :  { %1540 = vmatpush1.bf16.msra.mxu0 %v1539_v38  ;;  %1414 = vmatprep.subr.bf16.mxu1 %v1413_v39  ;;  %v165_v59 = vld [vmem:[#allocation5 + $0xb8] sm:$0xff]  ;;  %v291_v60 = vld [vmem:[#allocation5 + $0x4a8] sm:$0xff]  ;;  %v1547_v63 = vpack.c.bf16 %v288_v57, %v286_v55  ;;  %v162_v1 = vld [vmem:[#allocation5 + $0xa0] sm:$0xff] }
  0x69   :  { %1542 = vmatprep.subr.bf16.mxu0 %v1541_v43  ;;  %v293_v61 = vld [vmem:[#allocation5 + $0x4b8] sm:$0xff]  ;;  %v1421_v0 = vpack.c.bf16 %v165_v59, %v163_v58  ;;  %v164_v2 = vld [vmem:[#allocation5 + $0xb0] sm:$0xff]  ;;  %v290_v3 = vld [vmem:[#allocation5 + $0x4a0] sm:$0xff] }
  0x6a   :  { %v1549_v4 = vpack.c.bf16 %v293_v61, %v291_v60  ;;  %v292_v5 = vld [vmem:[#allocation5 + $0x4b0] sm:$0xff]  ;;  %v167_v6 = vld [vmem:[#allocation5 + $0xc8] sm:$0xff]  ;;  %v169_v7 = vld [vmem:[#allocation5 + $0xd8] sm:$0xff]  ;;  %v1423_v10 = vpack.c.bf16 %v164_v2, %v162_v1  ;;  %v2030_v60 = vshrl.u32 %v89_v47, 7 }
  0x6b   :  { %1416 = vmatpush1.bf16.msra.mxu1 %v1415_v50  ;;  %v295_v8 = vld [vmem:[#allocation5 + $0x4c8] sm:$0xff]  ;;  %v297_v9 = vld [vmem:[#allocation5 + $0x4d8] sm:$0xff]  ;;  %v1551_v11 = vpack.c.bf16 %v292_v5, %v290_v3  ;;  %v1425_v12 = vpack.c.bf16 %v169_v7, %v167_v6  ;;  %v166_v13 = vld [vmem:[#allocation5 + $0xc0] sm:$0xff] }
  0x6c   :  { %1544 = vmatpush1.bf16.msra.mxu0 %v1543_v51  ;;  %1418 = vmatprep.subr.bf16.mxu1 %v1417_v52  ;;  %v168_v14 = vld [vmem:[#allocation5 + $0xd0] sm:$0xff]  ;;  %v294_v15 = vld [vmem:[#allocation5 + $0x4c0] sm:$0xff]  ;;  %v1553_v16 = vpack.c.bf16 %v297_v9, %v295_v8  ;;  %v171_v18 = vld [vmem:[#allocation5 + $0xe8] sm:$0xff]  ;;  %vm467_vm0 = vcmp.lt.s32.totalorder %v2030_v60, 3  ;;  %vm554_vm2 = vcmp.lt.s32.totalorder %v2030_v60, 7  ;;  %vm434_vm3 = vcmp.lt.s32.totalorder %v2030_v60, 4 }
  0x6d   :  { %1546 = vmatprep.subr.bf16.mxu0 %v1545_v56  ;;  %v296_v17 = vld [vmem:[#allocation5 + $0x4d0] sm:$0xff]  ;;  %v173_v19 = vld [vmem:[#allocation5 + $0xf8] sm:$0xff]  ;;  %v299_v20 = vld [vmem:[#allocation5 + $0x4e8] sm:$0xff]  ;;  %v1427_v22 = vpack.c.bf16 %v168_v14, %v166_v13  ;;  %vm525_vm8 = vcmp.lt.s32.totalorder %v2030_v60, 1  ;;  %vm616_vm11 = vcmp.lt.s32.totalorder %v2030_v60, 5  ;;  %vm496_vm12 = vcmp.lt.s32.totalorder %v2030_v60, 2 }
  0x6e   :  { %v301_v21 = vld [vmem:[#allocation5 + $0x4f8] sm:$0xff]  ;;  %v1555_v23 = vpack.c.bf16 %v296_v17, %v294_v15  ;;  %v1429_v24 = vpack.c.bf16 %v173_v19, %v171_v18  ;;  %v170_v25 = vld [vmem:[#allocation5 + $0xe0] sm:$0xff]  ;;  %v172_v26 = vld [vmem:[#allocation5 + $0xf0] sm:$0xff]  ;;  %vm587_vm13 = vcmp.lt.s32.totalorder %v2030_v60, 6 }
  0x6f   :  { %1420 = vmatpush1.bf16.msra.mxu1 %v1419_v62  ;;  %v298_v27 = vld [vmem:[#allocation5 + $0x4e0] sm:$0xff]  ;;  %v1557_v28 = vpack.c.bf16 %v301_v21, %v299_v20  ;;  %v300_v29 = vld [vmem:[#allocation5 + $0x4f0] sm:$0xff]  ;;  %v175_v30 = vld [vmem:[#allocation5 + $0x108] sm:$0xff]  ;;  %v1431_v34 = vpack.c.bf16 %v172_v26, %v170_v25 }
  0x70   :  { %1548 = vmatpush1.bf16.msra.mxu0 %v1547_v63  ;;  %1422 = vmatprep.subr.bf16.mxu1 %v1421_v0  ;;  %v177_v31 = vld [vmem:[#allocation5 + $0x118] sm:$0xff]  ;;  %v303_v32 = vld [vmem:[#allocation5 + $0x508] sm:$0xff]  ;;  %v1559_v35 = vpack.c.bf16 %v300_v29, %v298_v27  ;;  %v174_v37 = vld [vmem:[#allocation5 + $0x100] sm:$0xff] }
  0x71   :  { %1550 = vmatprep.subr.bf16.mxu0 %v1549_v4  ;;  %v305_v33 = vld [vmem:[#allocation5 + $0x518] sm:$0xff]  ;;  %v1433_v36 = vpack.c.bf16 %v177_v31, %v175_v30  ;;  %v176_v38 = vld [vmem:[#allocation5 + $0x110] sm:$0xff]  ;;  %v302_v39 = vld [vmem:[#allocation5 + $0x500] sm:$0xff] }
  0x72   :  { %v1561_v40 = vpack.c.bf16 %v305_v33, %v303_v32  ;;  %v304_v41 = vld [vmem:[#allocation5 + $0x510] sm:$0xff]  ;;  %v179_v42 = vld [vmem:[#allocation5 + $0x128] sm:$0xff]  ;;  %v181_v43 = vld [vmem:[#allocation5 + $0x138] sm:$0xff]  ;;  %v1435_v46 = vpack.c.bf16 %v176_v38, %v174_v37 }
  0x73   :  { %1424 = vmatpush1.bf16.msra.mxu1 %v1423_v10  ;;  %v307_v44 = vld [vmem:[#allocation5 + $0x528] sm:$0xff]  ;;  %v309_v45 = vld [vmem:[#allocation5 + $0x538] sm:$0xff]  ;;  %v1563_v48 = vpack.c.bf16 %v304_v41, %v302_v39  ;;  %v1437_v49 = vpack.c.bf16 %v181_v43, %v179_v42  ;;  %v178_v50 = vld [vmem:[#allocation5 + $0x120] sm:$0xff]  ;;  %v2033_v10 = vand.u32 15, %v2030_v60 }
  0x74   :  { %1552 = vmatpush1.bf16.msra.mxu0 %v1551_v11  ;;  %1426 = vmatprep.subr.bf16.mxu1 %v1425_v12  ;;  %v180_v51 = vld [vmem:[#allocation5 + $0x130] sm:$0xff]  ;;  %v306_v52 = vld [vmem:[#allocation5 + $0x520] sm:$0xff]  ;;  %v1565_v53 = vpack.c.bf16 %v309_v45, %v307_v44  ;;  %v183_v55 = vld [vmem:[#allocation5 + $0x148] sm:$0xff] }
  0x75   :  { %1554 = vmatprep.subr.bf16.mxu0 %v1553_v16  ;;  %v308_v54 = vld [vmem:[#allocation5 + $0x530] sm:$0xff]  ;;  %v185_v56 = vld [vmem:[#allocation5 + $0x158] sm:$0xff]  ;;  %v311_v57 = vld [vmem:[#allocation5 + $0x548] sm:$0xff]  ;;  %v1439_v59 = vpack.c.bf16 %v180_v51, %v178_v50  ;;  %vm472_vm1 = vcmp.ge.s32.totalorder %v2033_v10, 3  ;;  %vm439_vm4 = vcmp.ge.s32.totalorder %v2033_v10, 4  ;;  %vm530_vm9 = vcmp.ge.s32.totalorder %v2033_v10, 1 }
  0x76   :  { %v313_v58 = vld [vmem:[#allocation5 + $0x558] sm:$0xff]  ;;  %v1567_v61 = vpack.c.bf16 %v308_v54, %v306_v52  ;;  %v1441_v62 = vpack.c.bf16 %v185_v56, %v183_v55  ;;  %v182_v63 = vld [vmem:[#allocation5 + $0x140] sm:$0xff]  ;;  %v184_v0 = vld [vmem:[#allocation5 + $0x150] sm:$0xff]  ;;  %vm501_vm14 = vcmp.ge.s32.totalorder %v2033_v10, 2 }
  0x77   :  { %1428 = vmatpush1.bf16.msra.mxu1 %v1427_v22  ;;  %v310_v1 = vld [vmem:[#allocation5 + $0x540] sm:$0xff]  ;;  %v1569_v2 = vpack.c.bf16 %v313_v58, %v311_v57  ;;  %v312_v3 = vld [vmem:[#allocation5 + $0x550] sm:$0xff]  ;;  %v187_v4 = vld [vmem:[#allocation5 + $0x168] sm:$0xff]  ;;  %v1443_v8 = vpack.c.bf16 %v184_v0, %v182_v63 }
  0x78   :  { %1556 = vmatpush1.bf16.msra.mxu0 %v1555_v23  ;;  %1430 = vmatprep.subr.bf16.mxu1 %v1429_v24  ;;  %v189_v5 = vld [vmem:[#allocation5 + $0x178] sm:$0xff]  ;;  %v315_v6 = vld [vmem:[#allocation5 + $0x568] sm:$0xff]  ;;  %v186_v9 = vld [vmem:[#allocation5 + $0x160] sm:$0xff]  ;;  %v1571_v11 = vpack.c.bf16 %v312_v3, %v310_v1 }
  0x79   :  { %1558 = vmatprep.subr.bf16.mxu0 %v1557_v28  ;;  %v317_v7 = vld [vmem:[#allocation5 + $0x578] sm:$0xff]  ;;  %v1445_v12 = vpack.c.bf16 %v189_v5, %v187_v4  ;;  %v188_v13 = vld [vmem:[#allocation5 + $0x170] sm:$0xff]  ;;  %v314_v14 = vld [vmem:[#allocation5 + $0x560] sm:$0xff] }
  0x7a   :  { %v316_v15 = vld [vmem:[#allocation5 + $0x570] sm:$0xff]  ;;  %v1573_v16 = vpack.c.bf16 %v317_v7, %v315_v6  ;;  %v191_v17 = vld [vmem:[#allocation5 + $0x188] sm:$0xff]  ;;  %v193_v18 = vld [vmem:[#allocation5 + $0x198] sm:$0xff]  ;;  %v1447_v25 = vpack.c.bf16 %v188_v13, %v186_v9 }
  0x7b   :  { %1432 = vmatpush1.bf16.msra.mxu1 %v1431_v34  ;;  %v2035_v19 = vld [vmem:[#allocation2] sm:$0xff]  ;;  %v319_v20 = vld [vmem:[#allocation5 + $0x588] sm:$0xff]  ;;  %v321_v21 = vld [vmem:[#allocation5 + $0x598] sm:$0xff]  ;;  %v1575_v28 = vpack.c.bf16 %v316_v15, %v314_v14  ;;  %v1449_v29 = vpack.c.bf16 %v193_v18, %v191_v17 }
  0x7c   :  { %1560 = vmatpush1.bf16.msra.mxu0 %v1559_v35  ;;  %1434 = vmatprep.subr.bf16.mxu1 %v1433_v36  ;;  %v2037_v22 = vld [vmem:[#allocation2 + $0x18] sm:$0xff]  ;;  %v463_v23 = vrot.slane %v2035_v19, 5  ;;  %v550_v24 = vrot.slane %v2035_v19, 1  ;;  %v2044_v27 = vld [vmem:[#allocation2 + $0x8] sm:$0xff]  ;;  %v190_v30 = vld [vmem:[#allocation5 + $0x180] sm:$0xff]  ;;  %v1577_v34 = vpack.c.bf16 %v321_v21, %v319_v20  ;;  %v430_v17 = vrot.slane %v2035_v19, 4 }
  0x7d   :  { %1562 = vmatprep.subr.bf16.mxu0 %v1561_v40  ;;  %v466_v26 = vrot.slane %v2037_v22, 5  ;;  %v192_v31 = vld [vmem:[#allocation5 + $0x190] sm:$0xff]  ;;  %v318_v32 = vld [vmem:[#allocation5 + $0x580] sm:$0xff]  ;;  %v551_v33 = vrot.slane %v2044_v27, 1  ;;  %v195_v36 = vld [vmem:[#allocation5 + $0x1a8] sm:$0xff]  ;;  %v433_v18 = vrot.slane %v2037_v22, 4 }
  0x7e   :  { %v320_v35 = vld [vmem:[#allocation5 + $0x590] sm:$0xff]  ;;  %v197_v37 = vld [vmem:[#allocation5 + $0x1b8] sm:$0xff]  ;;  %v323_v39 = vld [vmem:[#allocation5 + $0x5a8] sm:$0xff]  ;;  %v1451_v42 = vpack.c.bf16 %v192_v31, %v190_v30 }
  0x7f   :  { %1436 = vmatpush1.bf16.msra.mxu1 %v1435_v46  ;;  %v471_v38 = vsel %vm467_vm0, %v466_v26, %v463_v23  ;;  %v325_v40 = vld [vmem:[#allocation5 + $0x5b8] sm:$0xff]  ;;  %v557_v41 = vsel %vm554_vm2, %v550_v24, %v551_v33  ;;  %v1579_v43 = vpack.c.bf16 %v320_v35, %v318_v32  ;;  %v1453_v44 = vpack.c.bf16 %v197_v37, %v195_v36  ;;  %v194_v45 = vld [vmem:[#allocation5 + $0x1a0] sm:$0xff]  ;;  %v196_v46 = vld [vmem:[#allocation5 + $0x1b0] sm:$0xff] }
  0x80   :  { %1564 = vmatpush1.bf16.msra.mxu0 %v1563_v48  ;;  %1438 = vmatprep.subr.bf16.mxu1 %v1437_v49  ;;  %v322_v47 = vld [vmem:[#allocation5 + $0x5a0] sm:$0xff]  ;;  %v1581_v48 = vpack.c.bf16 %v325_v40, %v323_v39  ;;  %v324_v49 = vld [vmem:[#allocation5 + $0x5b0] sm:$0xff]  ;;  %v199_v50 = vld [vmem:[#allocation5 + $0x1c8] sm:$0xff]  ;;  %v1455_v54 = vpack.c.bf16 %v196_v46, %v194_v45  ;;  %v464_v37 = vrot.slane %v2044_v27, 5  ;;  %v431_v40 = vrot.slane %v2044_v27, 4 }
  0x81   :  { %1566 = vmatprep.subr.bf16.mxu0 %v1565_v53  ;;  %1338 = vmatprep.mubr.msk.f32.mxu1 %vm472_vm1, %v471_v38  ;;  %v201_v51 = vld [vmem:[#allocation5 + $0x1d8] sm:$0xff]  ;;  %v327_v52 = vld [vmem:[#allocation5 + $0x5c8] sm:$0xff]  ;;  %v1583_v55 = vpack.c.bf16 %v324_v49, %v322_v47  ;;  %v198_v57 = vld [vmem:[#allocation5 + $0x1c0] sm:$0xff]  ;;  %v2070_v38 = vsel %vm434_vm3, %v433_v18, %v430_v17 }
  0x82   :  { %915 = vmatprep.mubr.f32.mxu0 %v557_v41  ;;  %v329_v53 = vld [vmem:[#allocation5 + $0x5d8] sm:$0xff]  ;;  %v1457_v56 = vpack.c.bf16 %v201_v51, %v199_v50  ;;  %v200_v58 = vld [vmem:[#allocation5 + $0x1d0] sm:$0xff]  ;;  %v203_v63 = vld [vmem:[#allocation5 + $0x1e8] sm:$0xff] }
  0x83   :  { %1440 = vmatpush1.bf16.msra.mxu1 %v1439_v59  ;;  %v326_v59 = vld [vmem:[#allocation5 + $0x5c0] sm:$0xff]  ;;  %v205_v0 = vld [vmem:[#allocation5 + $0x1f8] sm:$0xff]  ;;  %v331_v1 = vld [vmem:[#allocation5 + $0x5e8] sm:$0xff]  ;;  %v1459_v3 = vpack.c.bf16 %v200_v58, %v198_v57 }
  0x84   :  { %1568 = vmatpush1.bf16.msra.mxu0 %v1567_v61  ;;  %1442 = vmatprep.subr.bf16.mxu1 %v1441_v62  ;;  %v1585_v61 = vpack.c.bf16 %v329_v53, %v327_v52  ;;  %v328_v62 = vld [vmem:[#allocation5 + $0x5d0] sm:$0xff]  ;;  %v1461_v5 = vpack.c.bf16 %v205_v0, %v203_v63  ;;  %v202_v6 = vld [vmem:[#allocation5 + $0x1e0] sm:$0xff]  ;;  %v209_v13 = vld [vmem:[#allocation5 + $0x218] sm:$0xff]  ;;  %v470_v52 = vsel %vm467_vm0, %v463_v23, %v464_v37 }
  0x85   :  { %1570 = vmatprep.subr.bf16.mxu0 %v1569_v2  ;;  %v333_v2 = vld [vmem:[#allocation5 + $0x5f8] sm:$0xff]  ;;  %v1587_v4 = vpack.c.bf16 %v328_v62, %v326_v59  ;;  %v204_v7 = vld [vmem:[#allocation5 + $0x1f0] sm:$0xff]  ;;  %v335_v14 = vld [vmem:[#allocation5 + $0x608] sm:$0xff] }
  0x86   :  { %v1589_v9 = vpack.c.bf16 %v333_v2, %v331_v1  ;;  %v337_v15 = vld [vmem:[#allocation5 + $0x618] sm:$0xff]  ;;  %v336_v31 = vld [vmem:[#allocation5 + $0x610] sm:$0xff]  ;;  %v211_v32 = vld [vmem:[#allocation5 + $0x228] sm:$0xff]  ;;  %v91_v2 = vadd.s32 8, %v2030_v60 }
  0x87   :  { %1444 = vmatpush1.bf16.msra.mxu1 %v1443_v8  ;;  %v330_v8 = vld [vmem:[#allocation5 + $0x5e0] sm:$0xff]  ;;  %v1593_v30 = vpack.c.bf16 %v337_v15, %v335_v14  ;;  %v339_v35 = vld [vmem:[#allocation5 + $0x628] sm:$0xff]  ;;  %v341_v36 = vld [vmem:[#allocation5 + $0x638] sm:$0xff] }
  0x88   :  { %1572 = vmatpush1.bf16.msra.mxu0 %v1571_v11  ;;  %1446 = vmatprep.subr.bf16.mxu1 %v1445_v12  ;;  %v332_v11 = vld [vmem:[#allocation5 + $0x5f0] sm:$0xff]  ;;  %v207_v12 = vld [vmem:[#allocation5 + $0x208] sm:$0xff]  ;;  %v338_v45 = vld [vmem:[#allocation5 + $0x620] sm:$0xff]  ;;  %v1597_v46 = vpack.c.bf16 %v341_v36, %v339_v35 }
  0x89   :  { %1574 = vmatprep.subr.bf16.mxu0 %v1573_v16  ;;  %v1463_v16 = vpack.c.bf16 %v204_v7, %v202_v6  ;;  %v1591_v20 = vpack.c.bf16 %v332_v11, %v330_v8  ;;  %v1465_v21 = vpack.c.bf16 %v209_v13, %v207_v12  ;;  %v340_v47 = vld [vmem:[#allocation5 + $0x630] sm:$0xff]  ;;  %v217_v49 = vld [vmem:[#allocation5 + $0x258] sm:$0xff]  ;;  %v343_v50 = vld [vmem:[#allocation5 + $0x648] sm:$0xff] }
  0x8a   :  { %v345_v51 = vld [vmem:[#allocation5 + $0x658] sm:$0xff]  ;;  %v214_v57 = vld [vmem:[#allocation5 + $0x240] sm:$0xff]  ;;  %v216_v58 = vld [vmem:[#allocation5 + $0x250] sm:$0xff] }
  0x8b   :  { %1448 = vmatpush1.bf16.msra.mxu1 %v1447_v25  ;;  %v206_v25 = vld [vmem:[#allocation5 + $0x200] sm:$0xff]  ;;  %v344_v23 = vld [vmem:[#allocation5 + $0x650] sm:$0xff]  ;;  %v219_v62 = vld [vmem:[#allocation5 + $0x268] sm:$0xff] }
  0x8c   :  { %1576 = vmatpush1.bf16.msra.mxu0 %v1575_v28  ;;  %1450 = vmatprep.subr.bf16.mxu1 %v1449_v29  ;;  %v208_v28 = vld [vmem:[#allocation5 + $0x210] sm:$0xff]  ;;  %v334_v29 = vld [vmem:[#allocation5 + $0x600] sm:$0xff]  ;;  %v221_v63 = vld [vmem:[#allocation5 + $0x278] sm:$0xff] }
  0x8d   :  { %1578 = vmatprep.subr.bf16.mxu0 %v1577_v34  ;;  %v213_v34 = vld [vmem:[#allocation5 + $0x238] sm:$0xff]  ;;  %v1467_v39 = vpack.c.bf16 %v208_v28, %v206_v25  ;;  %v1595_v41 = vpack.c.bf16 %v336_v31, %v334_v29  ;;  %v342_v59 = vld [vmem:[#allocation5 + $0x640] sm:$0xff]  ;;  %v347_v0 = vld [vmem:[#allocation5 + $0x668] sm:$0xff]  ;;  %v1477_v6 = vpack.c.bf16 %v221_v63, %v219_v62 }
  0x8e   :  { %v349_v1 = vld [vmem:[#allocation5 + $0x678] sm:$0xff]  ;;  %v218_v7 = vld [vmem:[#allocation5 + $0x260] sm:$0xff]  ;;  %v220_v8 = vld [vmem:[#allocation5 + $0x270] sm:$0xff] }
  0x8f   :  { %1452 = vmatpush1.bf16.msra.mxu1 %v1451_v42  ;;  %v1469_v42 = vpack.c.bf16 %v213_v34, %v211_v32  ;;  %v1605_v11 = vpack.c.bf16 %v349_v1, %v347_v0  ;;  %v348_v12 = vld [vmem:[#allocation5 + $0x670] sm:$0xff]  ;;  %v223_v13 = vld [vmem:[#allocation5 + $0x288] sm:$0xff]  ;;  %v225_v14 = vld [vmem:[#allocation5 + $0x298] sm:$0xff] }
  0x90   :  { %1580 = vmatpush1.bf16.msra.mxu0 %v1579_v43  ;;  %1454 = vmatprep.subr.bf16.mxu1 %v1453_v44  ;;  %v210_v43 = vld [vmem:[#allocation5 + $0x220] sm:$0xff]  ;;  %v212_v44 = vld [vmem:[#allocation5 + $0x230] sm:$0xff]  ;;  %v351_v15 = vld [vmem:[#allocation5 + $0x688] sm:$0xff]  ;;  %v1481_v28 = vpack.c.bf16 %v225_v14, %v223_v13 }
  0x91   :  { %1582 = vmatprep.subr.bf16.mxu0 %v1581_v48  ;;  %v215_v48 = vld [vmem:[#allocation5 + $0x248] sm:$0xff]  ;;  %v1471_v53 = vpack.c.bf16 %v212_v44, %v210_v43  ;;  %v222_v29 = vld [vmem:[#allocation5 + $0x280] sm:$0xff]  ;;  %v352_v34 = vld [vmem:[#allocation5 + $0x690] sm:$0xff]  ;;  %v553_v44 = vrot.slane %v2037_v22, 1 }
  0x92   :  { %v350_v31 = vld [vmem:[#allocation5 + $0x680] sm:$0xff]  ;;  %v227_v35 = vld [vmem:[#allocation5 + $0x2a8] sm:$0xff]  ;;  %v229_v36 = vld [vmem:[#allocation5 + $0x2b8] sm:$0xff] }
  0x93   :  { %1456 = vmatpush1.bf16.msra.mxu1 %v1455_v54  ;;  %v2086_v54 = vsel %vm434_vm3, %v430_v17, %v431_v40  ;;  %v2091_v17 = vand.u32 15, %v91_v2  ;;  %v2096_v43 = vld [vmem:[#allocation2 + $0x10] sm:$0xff]  ;;  %v361_v62 = vld [vmem:[#allocation5 + $0x6d8] sm:$0xff] }
  0x94   :  { %1584 = vmatpush1.bf16.msra.mxu0 %v1583_v55  ;;  %1458 = vmatprep.subr.bf16.mxu1 %v1457_v56  ;;  %v1599_v55 = vpack.c.bf16 %v340_v47, %v338_v45  ;;  %v1473_v56 = vpack.c.bf16 %v217_v49, %v215_v48  ;;  %v465_v47 = vrot.slane %v2096_v43, 5  ;;  %v432_v48 = vrot.slane %v2096_v43, 4  ;;  %v365_v13 = vld [vmem:[#allocation5 + $0x6f8] sm:$0xff] }
  0x95   :  { %1586 = vmatprep.subr.bf16.mxu0 %v1585_v61  ;;  %v1601_v61 = vpack.c.bf16 %v345_v51, %v343_v50  ;;  %vm564_vm5 = vcmp.le.s32.totalorder %v2091_v17, 14  ;;  %v1611_v49 = vpack.c.bf16 %v352_v34, %v350_v31  ;;  %v1485_v50 = vpack.c.bf16 %v229_v36, %v227_v35  ;;  %v226_v51 = vld [vmem:[#allocation5 + $0x2a0] sm:$0xff]  ;;  %v236_v31 = vld [vmem:[#allocation5 + $0x2f0] sm:$0xff]  ;;  %v241_v36 = vld [vmem:[#allocation5 + $0x318] sm:$0xff] }
  0x96   :  { %v2120_v63 = vsel %vm434_vm3, %v431_v40, %v432_v48  ;;  %v468_v2 = vsel %vm467_vm0, %v465_v47, %v466_v26  ;;  %v524_v40 = vrot.slane %v2037_v22, 7  ;;  %v363_v26 = vld [vmem:[#allocation5 + $0x6e8] sm:$0xff]  ;;  %v2143_v14 = vsel %vm434_vm3, %v432_v48, %v433_v18  ;;  %v364_v35 = vld [vmem:[#allocation5 + $0x6f0] sm:$0xff] }
  0x97   :  { %1460 = vmatpush1.bf16.msra.mxu1 %v1459_v3  ;;  %v92_v3 = vadd.s32 16, %v2030_v60  ;;  %v1621_v34 = vpack.c.bf16 %v365_v13, %v363_v26  ;;  %v240_v48 = vld [vmem:[#allocation5 + $0x310] sm:$0xff]  ;;  %vm622_vm15 = vcmp.le.s32.totalorder %v2091_v17, 12  ;;  %vm593_vm1 = vcmp.le.s32.totalorder %v2091_v17, 13 }
  0x98   :  { %1588 = vmatpush1.bf16.msra.mxu0 %v1587_v4  ;;  %1462 = vmatprep.subr.bf16.mxu1 %v1461_v5  ;;  %v1475_v4 = vpack.c.bf16 %v216_v58, %v214_v57  ;;  %v1603_v5 = vpack.c.bf16 %v344_v23, %v342_v59  ;;  %v231_v57 = vld [vmem:[#allocation5 + $0x2c8] sm:$0xff]  ;;  %v233_v58 = vld [vmem:[#allocation5 + $0x2d8] sm:$0xff]  ;;  %v376_v13 = vld [vmem:[#allocation5 + $0x750] sm:$0xff] }
  0x99   :  { %1590 = vmatprep.subr.bf16.mxu0 %v1589_v9  ;;  %v346_v9 = vld [vmem:[#allocation5 + $0x660] sm:$0xff]  ;;  %v359_v23 = vld [vmem:[#allocation5 + $0x6c8] sm:$0xff] }
  0x9a   :  { %v1607_v25 = vpack.c.bf16 %v348_v12, %v346_v9  ;;  %v360_v9 = vld [vmem:[#allocation5 + $0x6d0] sm:$0xff]  ;;  %v237_v12 = vld [vmem:[#allocation5 + $0x2f8] sm:$0xff] }
  0x9b   :  { %1464 = vmatpush1.bf16.msra.mxu1 %v1463_v16  ;;  %v353_v16 = vld [vmem:[#allocation5 + $0x698] sm:$0xff] }
  0x9c   :  { %1592 = vmatpush1.bf16.msra.mxu0 %v1591_v20  ;;  %1466 = vmatprep.subr.bf16.mxu1 %v1465_v21  ;;  %v2093_v20 = vand.u32 15, %v92_v3  ;;  %v1479_v21 = vpack.c.bf16 %v220_v8, %v218_v7  ;;  %v1609_v32 = vpack.c.bf16 %v353_v16, %v351_v15  ;;  %v358_v7 = vld [vmem:[#allocation5 + $0x6c0] sm:$0xff]  ;;  %v1617_v8 = vpack.c.bf16 %v361_v62, %v359_v23  ;;  %v244_v23 = vld [vmem:[#allocation5 + $0x330] sm:$0xff] }
  0x9d   :  { %1594 = vmatprep.subr.bf16.mxu0 %v1593_v30  ;;  %v224_v30 = vld [vmem:[#allocation5 + $0x290] sm:$0xff]  ;;  %v612_v15 = vrot.slane %v2035_v19, 3  ;;  %v613_v16 = vrot.slane %v2044_v27, 3  ;;  %v370_v62 = vld [vmem:[#allocation5 + $0x720] sm:$0xff] }
  0x9e   :  { %1339 = vmatmul.mubr.msk.f32.vlgmr.msra.gmra.mrb[0].mxu1 %vm439_vm4, %v2070_v38  ;;  %vm474_vm6 = vcmp.ge.s32.totalorder %v2093_v20, 3  ;;  %v1483_v45 = vpack.c.bf16 %v224_v30, %v222_v29  ;;  %vm441_vm7 = vcmp.ge.s32.totalorder %v2093_v20, 4  ;;  %v234_v30 = vld [vmem:[#allocation5 + $0x2e0] sm:$0xff] }
  0x9f   :  { %1468 = vmatpush1.bf16.msra.mxu1 %v1467_v39  ;;  %916 = vmatmul.mubr.f32.vlgmr.msra.gmra.mrb[0].mxu0 %v2035_v19  ;;  %v93_v39 = vadd.s32 24, %v2030_v60 }
  0xa0   :  { %1596 = vmatpush1.bf16.msra.mxu0 %v1595_v41  ;;  %1470 = vmatprep.subr.bf16.mxu1 %v1469_v42  ;;  %v355_v41 = vld [vmem:[#allocation5 + $0x6a8] sm:$0xff]  ;;  %v357_v42 = vld [vmem:[#allocation5 + $0x6b8] sm:$0xff] }
  0xa1   :  { %1598 = vmatprep.subr.bf16.mxu0 %v1597_v46  ;;  %743 = vmatprep.mubr.f32.mxu1 %v470_v52  ;;  %v552_v46 = vrot.slane %v2096_v43, 1  ;;  %v228_v52 = vld [vmem:[#allocation5 + $0x2b0] sm:$0xff] }
  0xa2   :  { %744 = vmatmul.mubr.f32.gmra.mrb[2].mxu1 %v2086_v54  ;;  %v1487_v0 = vpack.c.bf16 %v228_v52, %v226_v51  ;;  %v368_v51 = vld [vmem:[#allocation5 + $0x710] sm:$0xff]  ;;  %v243_v52 = vld [vmem:[#allocation5 + $0x328] sm:$0xff] }
  0xa3   :  { %1472 = vmatpush1.bf16.msra.mxu1 %v1471_v53  ;;  %v354_v53 = vld [vmem:[#allocation5 + $0x6a0] sm:$0xff]  ;;  %v556_v59 = vsel %vm554_vm2, %v551_v33, %v552_v46  ;;  %v2123_v33 = vand.u32 15, %v93_v39  ;;  %v555_v1 = vsel %vm554_vm2, %v552_v46, %v553_v44  ;;  %v367_v39 = vld [vmem:[#allocation5 + $0x708] sm:$0xff] }
  0xa4   :  { %1600 = vmatpush1.bf16.msra.mxu0 %v1599_v55  ;;  %1474 = vmatprep.subr.bf16.mxu1 %v1473_v56  ;;  %v1613_v55 = vpack.c.bf16 %v357_v42, %v355_v41  ;;  %v356_v56 = vld [vmem:[#allocation5 + $0x6b0] sm:$0xff]  ;;  %v369_v41 = vld [vmem:[#allocation5 + $0x718] sm:$0xff]  ;;  %v619_v42 = vsel %vm616_vm11, %v612_v15, %v613_v16 }
  0xa5   :  { %1602 = vmatprep.subr.bf16.mxu0 %v1601_v61  ;;  %v469_v61 = vsel %vm467_vm0, %v464_v37, %v465_v47  ;;  %1346 = vmatprep.mubr.msk.f32.mxu0 %vm564_vm5, %v556_v59  ;;  %v521_v37 = vrot.slane %v2035_v19, 7  ;;  %v1615_v3 = vpack.c.bf16 %v356_v56, %v354_v53  ;;  %vm566_vm10 = vcmp.le.s32.totalorder %v2123_v33, 14  ;;  %v238_v47 = vld [vmem:[#allocation5 + $0x300] sm:$0xff]  ;;  %v245_v53 = vld [vmem:[#allocation5 + $0x338] sm:$0xff] }
  0xa6   :  { %1340 = vmatprep.mubr.msk.f32.mxu1 %vm474_vm6, %v469_v61  ;;  %922 = vmatmul.mubr.f32.gmra.mrb[2].mxu0 %v2044_v27  ;;  %v373_v56 = vld [vmem:[#allocation5 + $0x738] sm:$0xff]  ;;  %v1501_v59 = vpack.c.bf16 %v245_v53, %v243_v52  ;;  %v242_v61 = vld [vmem:[#allocation5 + $0x320] sm:$0xff]  ;;  %v384_v52 = vld [vmem:[#allocation5 + $0x790] sm:$0xff]  ;;  %vm532_vm0 = vcmp.ge.s32.totalorder %v2093_v20, 1  ;;  %vm624_vm3 = vcmp.le.s32.totalorder %v2123_v33, 12  ;;  %vm595_vm4 = vcmp.le.s32.totalorder %v2123_v33, 13 }
  0xa7   :  { %1476 = vmatpush1.bf16.msra.mxu1 %v1475_v4  ;;  %v1489_v4 = vpack.c.bf16 %v233_v58, %v231_v57  ;;  %927 = vmatprep.mubr.f32.mxu0 %v555_v1  ;;  %v529_v18 = vsel %vm525_vm8, %v524_v40, %v521_v37  ;;  %v1499_v57 = vpack.c.bf16 %v240_v48, %v238_v47  ;;  %v372_v1 = vld [vmem:[#allocation5 + $0x730] sm:$0xff]  ;;  %v254_v48 = vld [vmem:[#allocation5 + $0x380] sm:$0xff]  ;;  %v259_v53 = vld [vmem:[#allocation5 + $0x3a8] sm:$0xff]  ;;  %vm642_vm5 = vcmp.le.s32.totalorder %v2091_v17, 11 }
  0xa8   :  { %1604 = vmatpush1.bf16.msra.mxu0 %v1603_v5  ;;  %1478 = vmatprep.subr.bf16.mxu1 %v1477_v6  ;;  %v230_v5 = vld [vmem:[#allocation5 + $0x2c0] sm:$0xff]  ;;  %v232_v6 = vld [vmem:[#allocation5 + $0x2d0] sm:$0xff]  ;;  %vm644_vm6 = vcmp.le.s32.totalorder %v2123_v33, 11 }
  0xa9   :  { %1606 = vmatprep.subr.bf16.mxu0 %v1605_v11  ;;  %v235_v11 = vld [vmem:[#allocation5 + $0x2e8] sm:$0xff]  ;;  %1341 = vmatmul.mubr.msk.f32.gmra.mrb[4].mxu1 %vm441_vm7, %v2120_v63  ;;  %v1128_v17 = vld [vmem:[#allocation8 + $0x10] sm:$0xff] }
  0xaa   :  { %755 = vmatprep.mubr.f32.mxu1 %v468_v2  ;;  %928 = vmatmul.mubr.f32.gmra.mrb[4].mxu0 %v2096_v43  ;;  %v1493_v29 = vpack.c.bf16 %v237_v12, %v235_v11  ;;  %v247_v2 = vld [vmem:[#allocation5 + $0x348] sm:$0xff]  ;;  %v248_v11 = vld [vmem:[#allocation5 + $0x350] sm:$0xff]  ;;  %v374_v12 = vld [vmem:[#allocation5 + $0x740] sm:$0xff] }
  0xab   :  { %1480 = vmatpush1.bf16.msra.mxu1 %v1479_v21  ;;  %v1491_v21 = vpack.c.bf16 %v232_v6, %v230_v5  ;;  %v377_v5 = vld [vmem:[#allocation5 + $0x758] sm:$0xff]  ;;  %v1503_v6 = vpack.c.bf16 %v244_v23, %v242_v61  ;;  %v258_v23 = vld [vmem:[#allocation5 + $0x3a0] sm:$0xff] }
  0xac   :  { %1608 = vmatpush1.bf16.msra.mxu0 %v1607_v25  ;;  %1482 = vmatprep.subr.bf16.mxu1 %v1481_v28  ;;  %v558_v25 = vsel %vm554_vm2, %v553_v44, %v550_v24  ;;  %v1619_v28 = vpack.c.bf16 %v360_v9, %v358_v7  ;;  %v239_v24 = vld [vmem:[#allocation5 + $0x308] sm:$0xff]  ;;  %v1495_v44 = vpack.c.bf16 %v236_v31, %v234_v30  ;;  %v246_v9 = vld [vmem:[#allocation5 + $0x340] sm:$0xff]  ;;  %vm503_vm2 = vcmp.ge.s32.totalorder %v2093_v20, 2 }
  0xad   :  { %1610 = vmatprep.subr.bf16.mxu0 %v1609_v32  ;;  %v362_v32 = vld [vmem:[#allocation5 + $0x6e0] sm:$0xff]  ;;  %756 = vmatmul.mubr.f32.gmra.mrb[6].mxu1 %v2143_v14  ;;  %v1497_v46 = vpack.c.bf16 %v241_v36, %v239_v24  ;;  %v1631_v7 = vpack.c.bf16 %v372_v1, %v370_v62  ;;  %v1635_v30 = vpack.c.bf16 %v376_v13, %v374_v12  ;;  %v380_v36 = vld [vmem:[#allocation5 + $0x770] sm:$0xff] }
  0xae   :  { %1347 = vmatprep.mubr.msk.f32.mxu0 %vm566_vm10, %v558_v25  ;;  %1342 = vmatprep.mubr.msk.f32.mxu1 %vm530_vm9, %v529_v18  ;;  %v253_v25 = vld [vmem:[#allocation5 + $0x378] sm:$0xff]  ;;  %v379_v18 = vld [vmem:[#allocation5 + $0x768] sm:$0xff]  ;;  %v260_v62 = vld [vmem:[#allocation5 + $0x3b0] sm:$0xff] }
  0xaf   :  { %1484 = vmatpush1.bf16.msra.mxu1 %v1483_v45  ;;  %934 = vmatmul.mubr.f32.gmra.mrb[6].mxu0 %v2037_v22  ;;  %v1623_v45 = vpack.c.bf16 %v364_v35, %v362_v32  ;;  %v250_v32 = vld [vmem:[#allocation5 + $0x360] sm:$0xff]  ;;  %v264_v12 = vld [vmem:[#allocation5 + $0x3d0] sm:$0xff] }
  0xb0   :  { %1612 = vmatpush1.bf16.msra.mxu0 %v1611_v49  ;;  %1486 = vmatprep.subr.bf16.mxu1 %v1485_v50  ;;  %v366_v49 = vld [vmem:[#allocation5 + $0x700] sm:$0xff]  ;;  %v1625_v50 = vpack.c.bf16 %v369_v41, %v367_v39  ;;  %v255_v39 = vld [vmem:[#allocation5 + $0x388] sm:$0xff]  ;;  %v257_v41 = vld [vmem:[#allocation5 + $0x398] sm:$0xff] }
  0xb1   :  { %1614 = vmatprep.subr.bf16.mxu0 %v1613_v55  ;;  %1004 = vmatprep.mubr.f32.mxu0 %v619_v42  ;;  %v371_v55 = vld [vmem:[#allocation5 + $0x728] sm:$0xff]  ;;  %v1627_v58 = vpack.c.bf16 %v368_v51, %v366_v49  ;;  %v378_v35 = vld [vmem:[#allocation5 + $0x760] sm:$0xff]  ;;  %v1513_v47 = vpack.c.bf16 %v257_v41, %v255_v39  ;;  %v256_v49 = vld [vmem:[#allocation5 + $0x390] sm:$0xff]  ;;  %v492_v41 = vrot.slane %v2035_v19, 6 }
  0xb2   :  { %v383_v42 = vld [vmem:[#allocation5 + $0x788] sm:$0xff]  ;;  %v396_v39 = vld [vmem:[#allocation5 + $0x7f0] sm:$0xff] }
  0xb3   :  { %1488 = vmatpush1.bf16.msra.mxu1 %v1487_v0  ;;  %v1629_v0 = vpack.c.bf16 %v373_v56, %v371_v55  ;;  %v261_v55 = vld [vmem:[#allocation5 + $0x3b8] sm:$0xff]  ;;  %v387_v56 = vld [vmem:[#allocation5 + $0x7a8] sm:$0xff] }
  0xb4   :  { %1616 = vmatpush1.bf16.msra.mxu0 %v1615_v3  ;;  %1490 = vmatprep.subr.bf16.mxu1 %v1489_v4  ;;  %v249_v3 = vld [vmem:[#allocation5 + $0x358] sm:$0xff]  ;;  %v375_v4 = vld [vmem:[#allocation5 + $0x748] sm:$0xff]  ;;  %v1517_v61 = vpack.c.bf16 %v261_v55, %v259_v53  ;;  %v400_v53 = vld [vmem:[#allocation5 + $0x810] sm:$0xff]  ;;  %v614_v55 = vrot.slane %v2096_v43, 3 }
  0xb5   :  { %1618 = vmatprep.subr.bf16.mxu0 %v1617_v8  ;;  %v1505_v8 = vpack.c.bf16 %v249_v3, %v247_v2  ;;  %v1633_v26 = vpack.c.bf16 %v377_v5, %v375_v4  ;;  %v388_v2 = vld [vmem:[#allocation5 + $0x7b0] sm:$0xff]  ;;  %v263_v3 = vld [vmem:[#allocation5 + $0x3c8] sm:$0xff]  ;;  %v265_v4 = vld [vmem:[#allocation5 + $0x3d8] sm:$0xff] }
  0xb6   :  { %v391_v5 = vld [vmem:[#allocation5 + $0x7c8] sm:$0xff] }
  0xb7   :  { %1492 = vmatpush1.bf16.msra.mxu1 %v1491_v21  ;;  %v251_v21 = vld [vmem:[#allocation5 + $0x368] sm:$0xff] }
  0xb8   :  { %1620 = vmatpush1.bf16.msra.mxu0 %v1619_v28  ;;  %1494 = vmatprep.subr.bf16.mxu1 %v1493_v29  ;;  %v381_v28 = vld [vmem:[#allocation5 + $0x778] sm:$0xff]  ;;  %v1507_v29 = vpack.c.bf16 %v248_v11, %v246_v9  ;;  %v1509_v31 = vpack.c.bf16 %v253_v25, %v251_v21  ;;  %v1521_v9 = vpack.c.bf16 %v265_v4, %v263_v3  ;;  %v262_v11 = vld [vmem:[#allocation5 + $0x3c0] sm:$0xff]  ;;  %v392_v21 = vld [vmem:[#allocation5 + $0x7d0] sm:$0xff] }
  0xb9   :  { %1622 = vmatprep.subr.bf16.mxu0 %v1621_v34  ;;  %v252_v34 = vld [vmem:[#allocation5 + $0x370] sm:$0xff]  ;;  %v1637_v24 = vpack.c.bf16 %v381_v28, %v379_v18  ;;  %v267_v25 = vld [vmem:[#allocation5 + $0x3e8] sm:$0xff]  ;;  %v269_v18 = vld [vmem:[#allocation5 + $0x3f8] sm:$0xff]  ;;  %v618_v4 = vsel %vm616_vm11, %v613_v16, %v614_v55 }
  0xba   :  { %v395_v28 = vld [vmem:[#allocation5 + $0x7e8] sm:$0xff]  ;;  %v404_v3 = vld [vmem:[#allocation5 + $0x830] sm:$0xff] }
  0xbb   :  { %1496 = vmatpush1.bf16.msra.mxu1 %v1495_v44  ;;  %v385_v44 = vld [vmem:[#allocation5 + $0x798] sm:$0xff] }
  0xbc   :  { %1624 = vmatpush1.bf16.msra.mxu0 %v1623_v45  ;;  %1498 = vmatprep.subr.bf16.mxu1 %v1497_v46  ;;  %v1511_v45 = vpack.c.bf16 %v252_v34, %v250_v32  ;;  %v1639_v46 = vpack.c.bf16 %v380_v36, %v378_v35  ;;  %v1641_v51 = vpack.c.bf16 %v385_v44, %v383_v42  ;;  %v266_v34 = vld [vmem:[#allocation5 + $0x3e0] sm:$0xff]  ;;  %v268_v35 = vld [vmem:[#allocation5 + $0x3f0] sm:$0xff]  ;;  %v399_v42 = vld [vmem:[#allocation5 + $0x808] sm:$0xff] }
  0xbd   :  { %1626 = vmatprep.subr.bf16.mxu0 %v1625_v50  ;;  %v382_v50 = vld [vmem:[#allocation5 + $0x780] sm:$0xff]  ;;  %v1525_v32 = vpack.c.bf16 %v269_v18, %v267_v25  ;;  %v401_v44 = vld [vmem:[#allocation5 + $0x818] sm:$0xff]  ;;  %v411_v25 = vld [vmem:[#allocation5 + $0x868] sm:$0xff] }
  0xbe   :  { %v394_v36 = vld [vmem:[#allocation5 + $0x7e0] sm:$0xff]  ;;  %v413_v18 = vld [vmem:[#allocation5 + $0x878] sm:$0xff] }
  0xbf   :  { %1500 = vmatpush1.bf16.msra.mxu1 %v1499_v57  ;;  %v389_v57 = vld [vmem:[#allocation5 + $0x7b8] sm:$0xff] }
  0xc0   :  { %1628 = vmatpush1.bf16.msra.mxu0 %v1627_v58  ;;  %1502 = vmatprep.subr.bf16.mxu1 %v1501_v59  ;;  %v1515_v58 = vpack.c.bf16 %v256_v49, %v254_v48  ;;  %v1643_v59 = vpack.c.bf16 %v384_v52, %v382_v50  ;;  %v1645_v1 = vpack.c.bf16 %v389_v57, %v387_v56  ;;  %v584_v48 = vrot.slane %v2044_v27, 2  ;;  %v398_v52 = vld [vmem:[#allocation5 + $0x800] sm:$0xff]  ;;  %v403_v56 = vld [vmem:[#allocation5 + $0x828] sm:$0xff]  ;;  %v405_v57 = vld [vmem:[#allocation5 + $0x838] sm:$0xff] }
  0xc1   :  { %1630 = vmatprep.subr.bf16.mxu0 %v1629_v0  ;;  %v386_v0 = vld [vmem:[#allocation5 + $0x7a0] sm:$0xff]  ;;  %v1655_v49 = vpack.c.bf16 %v396_v39, %v394_v36  ;;  %v522_v50 = vrot.slane %v2044_v27, 7  ;;  %v1661_v10 = vpack.c.bf16 %v405_v57, %v403_v56  ;;  %v417_v36 = vld [vmem:[#allocation5 + $0x898] sm:$0xff]  ;;  %v424_v56 = vld [vmem:[#allocation5 + $0x8d0] sm:$0xff] }
  0xc2   :  { %v427_v57 = vld [vmem:[#allocation5 + $0x8e8] sm:$0xff] }
  0xc3   :  { %1504 = vmatpush1.bf16.msra.mxu1 %v1503_v6  ;;  %v393_v6 = vld [vmem:[#allocation5 + $0x7d8] sm:$0xff] }
  0xc4   :  { %1632 = vmatpush1.bf16.msra.mxu0 %v1631_v7  ;;  %1506 = vmatprep.subr.bf16.mxu1 %v1505_v8  ;;  %v1519_v7 = vpack.c.bf16 %v260_v62, %v258_v23  ;;  %v1647_v8 = vpack.c.bf16 %v388_v2, %v386_v0  ;;  %v1649_v13 = vpack.c.bf16 %v393_v6, %v391_v5  ;;  %v523_v0 = vrot.slane %v2096_v43, 7  ;;  %v402_v2 = vld [vmem:[#allocation5 + $0x820] sm:$0xff]  ;;  %v407_v6 = vld [vmem:[#allocation5 + $0x848] sm:$0xff] }
  0xc5   :  { %1634 = vmatprep.subr.bf16.mxu0 %v1633_v26  ;;  %v390_v26 = vld [vmem:[#allocation5 + $0x7c0] sm:$0xff]  ;;  %v1659_v23 = vpack.c.bf16 %v400_v53, %v398_v52  ;;  %v528_v62 = vsel %vm525_vm8, %v521_v37, %v522_v50  ;;  %v615_v5 = vrot.slane %v2037_v22, 3  ;;  %v409_v37 = vld [vmem:[#allocation5 + $0x858] sm:$0xff]  ;;  %v1663_v16 = vpack.c.bf16 %v404_v3, %v402_v2 }
  0xc6   :  { %v1126_v2 = vld [vmem:[#allocation8] sm:$0xff] }
  0xc7   :  { %1508 = vmatpush1.bf16.msra.mxu1 %v1507_v29  ;;  %v397_v29 = vld [vmem:[#allocation5 + $0x7f8] sm:$0xff]  ;;  %v620_v20 = vsel %vm616_vm11, %v615_v5, %v612_v15 }
  0xc8   :  { %1636 = vmatpush1.bf16.msra.mxu0 %v1635_v30  ;;  %1510 = vmatprep.subr.bf16.mxu1 %v1509_v31  ;;  %v1523_v30 = vpack.c.bf16 %v264_v12, %v262_v11  ;;  %v1651_v31 = vpack.c.bf16 %v392_v21, %v390_v26  ;;  %v586_v11 = vrot.slane %v2037_v22, 2  ;;  %v1665_v12 = vpack.c.bf16 %v409_v37, %v407_v6  ;;  %v406_v26 = vld [vmem:[#allocation5 + $0x840] sm:$0xff] }
  0xc9   :  { %1638 = vmatprep.subr.bf16.mxu0 %v1637_v24  ;;  %v1653_v24 = vpack.c.bf16 %v397_v29, %v395_v28  ;;  %v617_v21 = vsel %vm616_vm11, %v614_v55, %v615_v5  ;;  %v422_v55 = vld [vmem:[#allocation5 + $0x8c0] sm:$0xff]  ;;  %v1144_v5 = vld [vmem:[#allocation8 + $0x90] sm:$0xff] }
  0xcb   :  { %1512 = vmatpush1.bf16.msra.mxu1 %v1511_v45  ;;  %v1527_v45 = vpack.c.bf16 %v268_v35, %v266_v34  ;;  %v410_v34 = vld [vmem:[#allocation5 + $0x860] sm:$0xff]  ;;  %v412_v35 = vld [vmem:[#allocation5 + $0x870] sm:$0xff] }
  0xcc   :  { %1640 = vmatpush1.bf16.msra.mxu0 %v1639_v46  ;;  %1514 = vmatprep.subr.bf16.mxu1 %v1513_v47  ;;  %v495_v46 = vrot.slane %v2037_v22, 6  ;;  %v583_v47 = vrot.slane %v2035_v19, 2  ;;  %v1671_v39 = vpack.c.bf16 %v412_v35, %v410_v34  ;;  %v418_v19 = vld [vmem:[#allocation5 + $0x8a0] sm:$0xff] }
  0xcd   :  { %1642 = vmatprep.subr.bf16.mxu0 %v1641_v51  ;;  %v1657_v51 = vpack.c.bf16 %v401_v44, %v399_v42  ;;  %v414_v42 = vld [vmem:[#allocation5 + $0x880] sm:$0xff]  ;;  %v416_v44 = vld [vmem:[#allocation5 + $0x890] sm:$0xff] }
  0xce   :  { %v591_v15 = vsel %vm587_vm13, %v586_v11, %v583_v47  ;;  %v1675_v22 = vpack.c.bf16 %v416_v44, %v414_v42  ;;  %v1139_v42 = vld [vmem:[#allocation8 + $0x68] sm:$0xff] }
  0xcf   :  { %1516 = vmatpush1.bf16.msra.mxu1 %v1515_v58  ;;  %v500_v58 = vsel %vm496_vm12, %v495_v46, %v492_v41 }
  0xd0   :  { %1644 = vmatpush1.bf16.msra.mxu0 %v1643_v59  ;;  %1518 = vmatprep.subr.bf16.mxu1 %v1517_v61  ;;  %v590_v59 = vsel %vm587_vm13, %v583_v47, %v584_v48  ;;  %v493_v61 = vrot.slane %v2044_v27, 6  ;;  %v494_v27 = vrot.slane %v2096_v43, 6  ;;  %v425_v47 = vld [vmem:[#allocation5 + $0x8d8] sm:$0xff] }
  0xd1   :  { %1646 = vmatprep.subr.bf16.mxu0 %v1645_v1  ;;  %v585_v1 = vrot.slane %v2096_v43, 2 }
  0xd2   :  { %v498_v28 = vsel %vm496_vm12, %v493_v61, %v494_v27 }
  0xd3   :  { %1520 = vmatpush1.bf16.msra.mxu1 %v1519_v7  ;;  %v499_v7 = vsel %vm496_vm12, %v492_v41, %v493_v61 }
  0xd4   :  { %1648 = vmatpush1.bf16.msra.mxu0 %v1647_v8  ;;  %1522 = vmatprep.subr.bf16.mxu1 %v1521_v9  ;;  %v527_v8 = vsel %vm525_vm8, %v522_v50, %v523_v0  ;;  %v589_v9 = vsel %vm587_vm13, %v584_v48, %v585_v1  ;;  %v421_v48 = vld [vmem:[#allocation5 + $0x8b8] sm:$0xff]  ;;  %v420_v50 = vld [vmem:[#allocation5 + $0x8b0] sm:$0xff] }
  0xd5   :  { %1650 = vmatprep.subr.bf16.mxu0 %v1649_v13  ;;  %v408_v13 = vld [vmem:[#allocation5 + $0x850] sm:$0xff]  ;;  %v1679_v52 = vpack.c.bf16 %v420_v50, %v418_v19 }
  0xd6   :  { %v1667_v29 = vpack.c.bf16 %v408_v13, %v406_v26  ;;  %v1132_v26 = vld [vmem:[#allocation8 + $0x30] sm:$0xff]  ;;  %v1133_v13 = vld [vmem:[#allocation8 + $0x38] sm:$0xff] }
  0xd7   :  { %1524 = vmatpush1.bf16.msra.mxu1 %v1523_v30  ;;  %v526_v30 = vsel %vm525_vm8, %v523_v0, %v524_v40  ;;  %v497_v40 = vsel %vm496_vm12, %v494_v27, %v495_v46  ;;  %v1932_v46 = vmov 0.0   ;;  %v1147_v27 = vld [vmem:[#allocation8 + $0xa8] sm:$0xff] }
  0xd8   :  { %1652 = vmatpush1.bf16.msra.mxu0 %v1651_v31  ;;  %1526 = vmatprep.subr.bf16.mxu1 %v1525_v32  ;;  %v588_v31 = vsel %vm587_vm13, %v585_v1, %v586_v11  ;;  %v1669_v32 = vpack.c.bf16 %v413_v18, %v411_v25  ;;  %v1142_v1 = vld [vmem:[#allocation8 + $0x80] sm:$0xff]  ;;  %v1151_v25 = vld [vmem:[#allocation8 + $0xc8] sm:$0xff]  ;;  %v1703_v18 = vpack.c.bf16 %v1133_v13, %v1132_v26 }
  0xd9   :  { %1654 = vmatprep.subr.bf16.mxu0 %v1653_v24  ;;  %v415_v24 = vld [vmem:[#allocation5 + $0x888] sm:$0xff] }
  0xda   :  { %v1673_v41 = vpack.c.bf16 %v417_v36, %v415_v24  ;;  %v1137_v24 = vld [vmem:[#allocation8 + $0x58] sm:$0xff]  ;;  %v1154_v36 = vld [vmem:[#allocation8 + $0xe0] sm:$0xff] }
  0xdb   :  { %1528 = vmatpush1.bf16.msra.mxu1 %v1527_v45  ;;  %v419_v45 = vld [vmem:[#allocation5 + $0x8a8] sm:$0xff] }
  0xdc   :  { %1656 = vmatpush1.bf16.msra.mxu0 %v1655_v49  ;;  %v1677_v49 = vpack.c.bf16 %v421_v48, %v419_v45  ;;  %v1156_v45 = vld [vmem:[#allocation8 + $0xf0] sm:$0xff]  ;;  %v1157_v48 = vld [vmem:[#allocation8 + $0xf8] sm:$0xff] }
  0xdd   :  { %1658 = vmatprep.subr.bf16.mxu0 %v1657_v51  ;;  %v423_v51 = vld [vmem:[#allocation5 + $0x8c8] sm:$0xff] }
  0xde   :  { %1343 = vmatmul.mubr.msk.f32.vlgmr.msra.gmra.mrb[0].mxu1 %vm501_vm14, %v500_v58  ;;  %v1681_v53 = vpack.c.bf16 %v425_v47, %v423_v51  ;;  %v429_v58 = vld [vmem:[#allocation5 + $0x8f8] sm:$0xff] }
  0xdf   :  { %1005 = vmatmul.mubr.f32.vlgmr.msra.gmra.mrb[0].mxu0 %v590_v59  ;;  %832 = vmatprep.mubr.f32.mxu1 %v528_v62  ;;  %v1683_v59 = vpack.c.bf16 %v424_v56, %v422_v55  ;;  %v1685_v61 = vpack.c.bf16 %v429_v58, %v427_v57  ;;  %v428_v62 = vld [vmem:[#allocation5 + $0x8f0] sm:$0xff]  ;;  %v665_v58 = vsub.s32 0, %v2030_v60 }
  0xe0   :  { %1660 = vmatpush1.bf16.msra.mxu0 %v1659_v23  ;;  %1348 = vmatprep.mubr.msk.f32.mxu0 %vm622_vm15, %v618_v4  ;;  %v426_v23 = vld [vmem:[#allocation5 + $0x8e0] sm:$0xff]  ;;  %v1127_v4 = vld [vmem:[#allocation8 + $0x8] sm:$0xff] }
  0xe1   :  { %1662 = vmatprep.subr.bf16.mxu0 %v1661_v10  ;;  %v1687_v0 = vpack.c.bf16 %v428_v62, %v426_v23  ;;  %v1143_v10 = vld [vmem:[#allocation8 + $0x88] sm:$0xff]  ;;  %v1691_v6 = vpack.c.bf16 %v1127_v4, %v1126_v2 }
  0xe2   :  { %833 = vmatmul.mubr.f32.gmra.mrb[2].mxu1 %v499_v7  ;;  %v1689_v3 = vpack.c.bf16 %v1143_v10, %v1142_v1  ;;  %v1129_v7 = vld [vmem:[#allocation8 + $0x18] sm:$0xff] }
  0xe3   :  { %1344 = vmatprep.mubr.msk.f32.mxu1 %vm532_vm0, %v527_v8  ;;  %1349 = vmatmul.mubr.msk.f32.gmra.mrb[2].mxu0 %vm593_vm1, %v589_v9  ;;  %v1148_v8 = vld [vmem:[#allocation8 + $0xb0] sm:$0xff]  ;;  %v1149_v9 = vld [vmem:[#allocation8 + $0xb8] sm:$0xff] }
  0xe4   :  { %1664 = vmatpush1.bf16.msra.mxu0 %v1663_v16  ;;  %1016 = vmatprep.mubr.f32.mxu0 %v617_v21  ;;  %v1130_v16 = vld [vmem:[#allocation8 + $0x20] sm:$0xff] }
  0xe5   :  { %1666 = vmatprep.subr.bf16.mxu0 %v1665_v12  ;;  %1690 = vmatprep.subr.bf16.mxu1 %v1689_v3  ;;  %v1701_v12 = vpack.c.bf16 %v1149_v9, %v1148_v8  ;;  %v1150_v21 = vld [vmem:[#allocation8 + $0xc0] sm:$0xff] }
  0xe6   :  { %1345 = vmatmul.mubr.msk.f32.gmra.mrb[4].mxu1 %vm503_vm2, %v498_v28  ;;  %v1705_v28 = vpack.c.bf16 %v1151_v25, %v1150_v21 }
  0xe7   :  { %844 = vmatprep.mubr.f32.mxu1 %v526_v30  ;;  %1017 = vmatmul.mubr.f32.gmra.mrb[4].mxu0 %v588_v31  ;;  %v1135_v30 = vld [vmem:[#allocation8 + $0x48] sm:$0xff]  ;;  %v1152_v31 = vld [vmem:[#allocation8 + $0xd0] sm:$0xff] }
  0xe8   :  { %1668 = vmatpush1.bf16.msra.mxu0 %v1667_v29  ;;  %1350 = vmatprep.mubr.msk.f32.mxu0 %vm624_vm3, %v620_v20  ;;  %v1134_v29 = vld [vmem:[#allocation8 + $0x40] sm:$0xff]  ;;  %v1136_v20 = vld [vmem:[#allocation8 + $0x50] sm:$0xff] }
  0xe9   :  { %1670 = vmatprep.subr.bf16.mxu0 %v1669_v32  ;;  %1692 = vmatpush3.bf16.msra.mxu1 %v1691_v6  ;;  %v1153_v32 = vld [vmem:[#allocation8 + $0xd8] sm:$0xff]  ;;  %v1707_v34 = vpack.c.bf16 %v1135_v30, %v1134_v29 }
  0xea   :  { %845 = vmatmul.mubr.f32.gmra.mrb[6].mxu1 %v497_v40  ;;  %v1709_v35 = vpack.c.bf16 %v1153_v32, %v1152_v31  ;;  %v1155_v40 = vld [vmem:[#allocation8 + $0xe8] sm:$0xff] }
  0xeb   :  { %1351 = vmatmul.mubr.msk.f32.gmra.mrb[6].mxu0 %vm595_vm4, %v591_v15  ;;  %v1713_v15 = vpack.c.bf16 %v1155_v40, %v1154_v36 }
  0xec   :  { %1672 = vmatpush1.bf16.msra.mxu0 %v1671_v39  ;;  %1093 = vmatprep.mubr.f32.mxu0 %v1932_v46  ;;  %v1711_v39 = vpack.c.bf16 %v1137_v24, %v1136_v20 }
  0xed   :  { %1674 = vmatprep.subr.bf16.mxu0 %v1673_v41  ;;  %v1138_v41 = vld [vmem:[#allocation8 + $0x60] sm:$0xff] }
  0xee   :  { %v1715_v44 = vpack.c.bf16 %v1139_v42, %v1138_v41 }
  0xf0   :  { %1676 = vmatpush1.bf16.msra.mxu0 %v1675_v22  ;;  %v1717_v22 = vpack.c.bf16 %v1157_v48, %v1156_v45 }
  0xf1   :  { %1678 = vmatprep.subr.bf16.mxu0 %v1677_v49  ;;  %v1141_v49 = vld [vmem:[#allocation8 + $0x78] sm:$0xff] }
  0xf4   :  { %1680 = vmatpush1.bf16.msra.mxu0 %v1679_v52 }
  0xf5   :  { %1682 = vmatprep.subr.bf16.mxu0 %v1681_v53 }
  0xf8   :  { %1684 = vmatpush1.bf16.msra.mxu0 %v1683_v59  ;;  %v661_v59 = vld [vmem:[#allocation7] sm:$0x3] }
  0xf9   :  { %1686 = vmatprep.subr.bf16.mxu0 %v1685_v61  ;;  %v669_v61 = vsub.s32 1, %v2030_v60  ;;  %v666_v23 = vrot.slane %v661_v59, %v665_v58 }
  0xfb   :  { %v670_v62 = vrot.slane %v661_v59, %v669_v61 }
  0xfc   :  { %1688 = vmatpush1.bf16.msra.mxu0 %v1687_v0 }
  0xff   :  { %1094 = vmatmul.mubr.f32.vlgmr.msra.gmra.mrb[0].mxu0 %v2086_v54  ;;  %v1145_v54 = vld [vmem:[#allocation8 + $0x98] sm:$0xff] }
 0x100   :  { %1099 = vmatprep.mubr.f32.mxu0 %v1932_v46  ;;  %v1693_v37 = vpack.c.bf16 %v1145_v54, %v1144_v5 }
 0x102   :  { %1694 = vmatprep.subr.bf16.mxu1 %v1693_v37 }
 0x103   :  { %1352 = vmatmul.mubr.msk.f32.gmra.mrb[2].mxu0 %vm642_vm5, %v2120_v63  ;;  %v1146_v63 = vld [vmem:[#allocation8 + $0xa0] sm:$0xff] }
 0x104   :  { %1105 = vmatprep.mubr.f32.mxu0 %v1932_v46  ;;  %v1697_v33 = vpack.c.bf16 %v1147_v27, %v1146_v63 }
 0x107   :  { %1106 = vmatmul.mubr.f32.gmra.mrb[4].mxu0 %v2143_v14  ;;  %v1695_v14 = vpack.c.bf16 %v1129_v7, %v1128_v17 }
 0x108   :  { %1111 = vmatprep.mubr.f32.mxu0 %v1932_v46  ;;  %v1140_v46 = vld [vmem:[#allocation8 + $0x70] sm:$0xff] }
 0x109   :  { %1696 = vmatpush3.bf16.msra.mxu1 %v1695_v14  ;;  %v1719_v19 = vpack.c.bf16 %v1141_v49, %v1140_v46 }
 0x10a   :  { %1698 = vmatprep.subr.bf16.mxu1 %v1697_v33 }
 0x10b   :  { %1353 = vmatmul.mubr.msk.f32.gmra.mrb[6].mxu0 %vm644_vm6, %v2070_v38  ;;  %v1131_v38 = vld [vmem:[#allocation8 + $0x28] sm:$0xff] }
 0x10c   :  { %v1699_v11 = vpack.c.bf16 %v1131_v38, %v1130_v16 }
 0x10e   :  { %1700 = vmatpush3.bf16.msra.mxu1 %v1699_v11 }
 0x10f   :  { %1702 = vmatprep.subr.bf16.mxu1 %v1701_v12 }
 0x112   :  { %1704 = vmatpush3.bf16.msra.mxu1 %v1703_v18 }
 0x113   :  { %1706 = vmatprep.subr.bf16.mxu1 %v1705_v28 }
 0x116   :  { %1708 = vmatpush3.bf16.msra.mxu1 %v1707_v34  ;;  %v1354_v34 = vld [vmem:[#allocation10] ss:$0 sm:$0xff] }
 0x117   :  { %1710 = vmatprep.subr.bf16.mxu1 %v1709_v35 }
 0x11a   :  { %1712 = vmatpush3.bf16.msra.mxu1 %v1711_v39 }
 0x11b   :  { %1714 = vmatprep.subr.bf16.mxu1 %v1713_v15  ;;  %v1780_v15 = vld [vmem:[#allocation2] sm:$0xff] }
 0x11e   :  { %1716 = vmatpush3.bf16.msra.mxu1 %v1715_v44 }
 0x11f   :  { %1718 = vmatprep.subr.bf16.mxu1 %v1717_v22  ;;  %v1781_v22 = vld [vmem:[#allocation2 + $0x8] sm:$0xff] }
 0x122   :  { %1720 = vmatpush3.bf16.msra.mxu1 %v1719_v19 }
 0x1b1   :  { %v828_v50 = vpop.f32.mrb[0].mxu1 }
 0x1b2   :  { %v830_v51 = vpop.f32.mrb[1].mxu1  ;;  %v1721_v0 = vadd.f32 %v828_v50, %v666_v23 }
 0x1b3   :  { %v1723_v1 = vadd.f32 %v830_v51, %v670_v62 }
 0x1b5   :  { %v834_v47 = vpop.f32.mrb[2].mxu1 }
 0x1b6   :  { %v836_v52 = vpop.f32.mrb[3].mxu1  ;;  %v1725_v5 = vadd.f32 %v834_v47, %v666_v23 }
 0x1b7   :  { %v1727_v54 = vadd.f32 %v836_v52, %v670_v62 }
 0x1b9   :  { %v840_v53 = vpop.f32.mrb[4].mxu1 }
 0x1ba   :  { %v842_v55 = vpop.f32.mrb[5].mxu1  ;;  %v1729_v14 = vadd.f32 %v840_v53, %v666_v23  ;;  %v1782_v53 = vld [vmem:[#allocation2 + $0x18] sm:$0xff] }
 0x1bb   :  { %v1731_v60 = vadd.f32 %v842_v55, %v670_v62 }
 0x1bd   :  { %v846_v56 = vpop.f32.mrb[6].mxu1 }
 0x1be   :  { %v848_v57 = vpop.f32.mrb[7].mxu1  ;;  %v1733_v12 = vadd.f32 %v846_v56, %v666_v23 }
 0x1bf   :  { %v1735_v26 = vadd.f32 %v848_v57, %v670_v62 }
 0x1d2   :  { %v1095_v10 = vpop.f32.mrb[0].mxu0 }
 0x1d3   :  { %v1722_v2 = vadd.f32 %v1721_v0, %v1095_v10  ;;  %v1097_v3 = vpop.f32.mrb[1].mxu0 }
 0x1d4   :  { %v1724_v4 = vadd.f32 %v1723_v1, %v1097_v3 }
 0x1d5   :  { %v1118_v17 = vmax.f32 %v1722_v2, 0.0 }
 0x1d6   :  { %v1119_v6 = vmax.f32 %v1724_v4, 0.0  ;;  %v1101_v37 = vpop.f32.mrb[2].mxu0 }
 0x1d7   :  { %v1726_v7 = vadd.f32 %v1725_v5, %v1101_v37  ;;  %v1103_v63 = vpop.f32.mrb[3].mxu0 }
 0x1d8   :  { %v1728_v27 = vadd.f32 %v1727_v54, %v1103_v63  ;;  %1227 = vmatprep.mubr.f32.mxu1 %v1119_v6 }
 0x1d9   :  { %1228 = vmatmul.mubr.f32.vlgmr.msra.gmra.mrb[8].mxu1 %v1118_v17  ;;  %v1120_v38 = vmax.f32 %v1726_v7, 0.0 }
 0x1da   :  { %v1121_v33 = vmax.f32 %v1728_v27, 0.0  ;;  %v1107_v16 = vpop.f32.mrb[4].mxu0 }
 0x1db   :  { %v1730_v8 = vadd.f32 %v1729_v14, %v1107_v16  ;;  %v1109_v9 = vpop.f32.mrb[5].mxu0 }
 0x1dc   :  { %v1732_v11 = vadd.f32 %v1731_v60, %v1109_v9  ;;  %1232 = vmatprep.mubr.f32.mxu1 %v1121_v33 }
 0x1dd   :  { %1233 = vmatmul.mubr.f32.gmra.mrb[10].mxu1 %v1120_v38  ;;  %v1122_v25 = vmax.f32 %v1730_v8, 0.0 }
 0x1de   :  { %v1123_v13 = vmax.f32 %v1732_v11, 0.0  ;;  %v1113_v21 = vpop.f32.mrb[6].mxu0  ;;  %v1355_v11 = vld [vmem:[#allocation10 + $0x1] ss:$0 sm:$0xff] }
 0x1df   :  { %v1734_v18 = vadd.f32 %v1733_v12, %v1113_v21  ;;  %v1115_v28 = vpop.f32.mrb[7].mxu0 }
 0x1e0   :  { %v1736_v29 = vadd.f32 %v1735_v26, %v1115_v28  ;;  %1237 = vmatprep.mubr.f32.mxu1 %v1123_v13  ;;  %v1356_v26 = vld [vmem:[#allocation10 + $0x2] ss:$0 sm:$0xff] }
 0x1e1   :  { %1238 = vmatmul.mubr.f32.gmra.mrb[12].mxu1 %v1122_v25  ;;  %v1124_v31 = vmax.f32 %v1734_v18, 0.0 }
 0x1e2   :  { %v1125_v30 = vmax.f32 %v1736_v29, 0.0 }
 0x1e4   :  { %1242 = vmatprep.mubr.f32.mxu1 %v1125_v30 }
 0x1e5   :  { %1243 = vmatmul.mubr.f32.gmra.mrb[14].mxu1 %v1124_v31 }
 0x2ac   :  { %v1389_v32 = vpop.f32.mrb[8].mxu1 }
 0x2ad   :  { %v1390_v35 = vpop.f32.mrb[9].mxu1 }
 0x2ae   :  { %v1391_v20 = vadd.f32 %v1390_v35, %v1389_v32 }
 0x2b0   :  { %v1230_v24 = vadd.f32 %v1391_v20, %v1354_v34  ;;  %v1392_v36 = vpop.f32.mrb[10].mxu1 }
 0x2b1   :  { %v1393_v40 = vpop.f32.mrb[11].mxu1 }
 0x2b2   :  { %v1394_v39 = vadd.f32 %v1393_v40, %v1392_v36  ;;  %v1248_v41 = vadd.f32 %v1780_v15, %v1230_v24 }
 0x2b4   :  { %v1235_v42 = vadd.f32 %v1394_v39, %v1354_v34  ;;  %v1395_v44 = vpop.f32.mrb[12].mxu1  ;;  %1252 = vadd.xlane.f32.xlu0 %v1248_v41 }
 0x2b5   :  { %v1396_v45 = vpop.f32.mrb[13].mxu1 }
 0x2b6   :  { %v1397_v48 = vadd.f32 %v1396_v45, %v1395_v44  ;;  %v1249_v46 = vadd.f32 %v1781_v22, %v1235_v42 }
 0x2b8   :  { %v1240_v49 = vadd.f32 %v1397_v48, %v1354_v34  ;;  %1254 = vadd.xlane.f32.xlu0 %v1249_v46  ;;  %v1398_v19 = vpop.f32.mrb[14].mxu1 }
 0x2b9   :  { %v1399_v50 = vpop.f32.mrb[15].mxu1 }
 0x2ba   :  { %v1400_v51 = vadd.f32 %v1399_v50, %v1398_v19  ;;  %v1250_v47 = vadd.f32 %v1240_v49, %v2096_v43 }
 0x2bc   :  { %v1245_v52 = vadd.f32 %v1400_v51, %v1354_v34  ;;  %1256 = vadd.xlane.f32.xlu1 %v1250_v47 }
 0x2be   :  { %v1251_v55 = vadd.f32 %v1782_v53, %v1245_v52 }
 0x2c0   :  { %1258 = vadd.xlane.f32.xlu1 %v1251_v55 }
 0x341   :  { %v1253_v56 = vpop.xlane.xlu0 %1252 }
 0x342   :  { %v1261_v57 = vmul.f32 0.0078125, %v1253_v56 }
 0x344   :  { %v1265_v58 = vsub.f32 %v1248_v41, %v1261_v57 }
 0x345   :  { %v1255_v59 = vpop.xlane.xlu0 %1254 }
 0x346   :  { %v1262_v61 = vmul.f32 0.0078125, %v1255_v59  ;;  %v1269_v23 = vmul.f32 %v1265_v58, %v1265_v58 }
 0x348   :  { %v1266_v62 = vsub.f32 %v1249_v46, %v1262_v61  ;;  %1273 = vadd.xlane.f32.xlu0 %v1269_v23 }
 0x349   :  { %v1257_v0 = vpop.xlane.xlu1 %1256 }
 0x34a   :  { %v1263_v1 = vmul.f32 0.0078125, %v1257_v0  ;;  %v1270_v10 = vmul.f32 %v1266_v62, %v1266_v62 }
 0x34c   :  { %v1267_v2 = vsub.f32 %v1250_v47, %v1263_v1  ;;  %1275 = vadd.xlane.f32.xlu1 %v1270_v10 }
 0x34d   :  { %v1259_v3 = vpop.xlane.xlu1 %1258 }
 0x34e   :  { %v1264_v43 = vmul.f32 0.0078125, %v1259_v3  ;;  %v1271_v4 = vmul.f32 %v1267_v2, %v1267_v2 }
 0x350   :  { %v1268_v5 = vsub.f32 %v1251_v55, %v1264_v43  ;;  %1277 = vadd.xlane.f32.xlu0 %v1271_v4 }
 0x352   :  { %v1272_v54 = vmul.f32 %v1268_v5, %v1268_v5 }
 0x354   :  { %1279 = vadd.xlane.f32.xlu1 %v1272_v54 }
 0x3d5   :  { %v1274_v6 = vpop.xlane.xlu0 %1273 }
 0x3d6   :  { %v1281_v37 = vmul.f32 0.0078125, %v1274_v6 }
 0x3d8   :  { %v1285_v17 = vadd.f32 1e-05, %v1281_v37 }
 0x3d9   :  { %v1276_v7 = vpop.xlane.xlu1 %1275 }
 0x3da   :  { %1772 = vrsqrt.f32 %v1285_v17  ;;  %v1282_v63 = vmul.f32 0.0078125, %v1276_v7 }
 0x3dc   :  { %v1286_v27 = vadd.f32 1e-05, %v1282_v63 }
 0x3dd   :  { %v1278_v14 = vpop.xlane.xlu0 %1277 }
 0x3de   :  { %1774 = vrsqrt.f32 %v1286_v27  ;;  %v1283_v60 = vmul.f32 0.0078125, %v1278_v14 }
 0x3e0   :  { %v1287_v33 = vadd.f32 1e-05, %v1283_v60 }
 0x3e1   :  { %v1280_v16 = vpop.xlane.xlu1 %1279 }
 0x3e2   :  { %1776 = vrsqrt.f32 %v1287_v33  ;;  %v1284_v38 = vmul.f32 0.0078125, %v1280_v16 }
 0x3e4   :  { %v1773_v8 = vpop.eup %1772  ;;  %v1288_v9 = vadd.f32 1e-05, %v1284_v38 }
 0x3e5   :  { %v1293_v12 = vmul.f32 %v1773_v8, %v1265_v58 }
 0x3e6   :  { %1778 = vrsqrt.f32 %v1288_v9 }
 0x3e7   :  { %v1302_v13 = vmul.f32 %v1355_v11, %v1293_v12 }
 0x3e8   :  { %v1775_v21 = vpop.eup %1774 }
 0x3e9   :  { %v1294_v25 = vmul.f32 %v1775_v21, %v1266_v62  ;;  %v1311_v18 = vadd.f32 %v1356_v26, %v1302_v13 }
 0x3eb   :  { %v1303_v28 = vmul.f32 %v1355_v11, %v1294_v25  ;;  %1315 = vst [vmem:[#allocation11] sm:$0xff] %v1311_v18 }
 0x3ec   :  { %v1777_v29 = vpop.eup %1776 }
 0x3ed   :  { %v1295_v30 = vmul.f32 %v1777_v29, %v1267_v2  ;;  %v1312_v31 = vadd.f32 %v1356_v26, %v1303_v28 }
 0x3ef   :  { %v1304_v32 = vmul.f32 %v1355_v11, %v1295_v30  ;;  %1316 = vst [vmem:[#allocation11 + $0x8] sm:$0xff] %v1312_v31 }
 0x3f0   :  { %v1779_v34 = vpop.eup %1778 }
 0x3f1   :  { %v1296_v35 = vmul.f32 %v1779_v34, %v1268_v5  ;;  %v1313_v20 = vadd.f32 %v1356_v26, %v1304_v32 }
 0x3f3   :  { %v1305_v24 = vmul.f32 %v1355_v11, %v1296_v35  ;;  %1317 = vst [vmem:[#allocation11 + $0x10] sm:$0xff] %v1313_v20 }
 0x3f5   :  { %v1314_v36 = vadd.f32 %v1356_v26, %v1305_v24 }
 0x3f7   :  { %1318 = vst [vmem:[#allocation11 + $0x18] sm:$0xff] %v1314_v36 }
 0x3f8   :  { %1904 = shalt.err (!%p1901_p2)
}
 0x3f9   :  { %s1905_s7 = scalar_lea.hbm %s2270_s5, 512 }
 0x3fa   :  { %p1906_p3 = scmp.ne.s32.totalorder %s2270_s5, %s1905_s7  ;;  %p1909_p4 = scmp.lt.u32.totalorder %s1905_s7, %s2270_s5 }
 0x3fc   :  { %p1911_p5 = pnand %p1909_p4, %p1906_p3 }
 0x3fe   :  { %1914 = shalt.err (!%p1911_p5)
}
 0x3ff   :  { %1330 = dma.vmem_to_hbm [thread:$0]  %s1325_s29, 512, %s2270_s5, [#allocation4], %s1928_s18, %s1928_s18, %s1929_s19  }
 0x400   :  { %1921 = dma.done.wait [#allocation4], 512  }
 0x401   :  { %1922 = vsyncadd [#allocation4], 4294966784 }
 0x402   :  { %1334 = vsyncpa [#allocation3], 1 }
 0x403   :  { %1335 = vsyncpa [#allocation6], 1 }
 0x404   :  { %1336 = vsyncpa [#allocation9], 1 }
 0x405   :  { %1337 = vsyncpa [#allocation4], 1 }

</bundles_post_ra>
